<compile_context>
chip_gen: v7x
topology: tpu7x:2x2x1
jax: 0.10.0
libtpu: 0.0.40
codegen_flags: <defaults>
</compile_context>

<pallas_src>
import jax
import jax.numpy as jnp
from jax.experimental import pallas as pl
from jax.experimental.pallas import tpu as pltpu


# --------------------------------------------------------------------------- #
# Geometry helpers
# --------------------------------------------------------------------------- #
def _round_up(v, m):
    return ((v + m - 1) // m) * m


def _geometry(h, w):
    """Per-image slab sizes on the flattened (y*w + x) row representation."""
    hp, wp = (h - 4) // 2, (w - 4) // 2            # pooled output spatial dims
    anchor_max = 2 * (hp - 1) * w + 2 * (wp - 1)   # last pooled anchor row
    l2 = _round_up(anchor_max + w + 2, 16)         # conv2 rows carried (192)
    l1 = _round_up(l2 + 2 * w + 2, 16)             # conv1 rows carried (240)
    lp = l2 - w - 1                                # pooled slab rows   (175)
    return hp, wp, l1, l2, lp


# --------------------------------------------------------------------------- #
# Fused per-image kernel
# --------------------------------------------------------------------------- #
def _make_kernel(w, hp, wp, l2, lp):
    """One grid step = one image.  Activations live as (rows, C) slabs where
    row = y*w + x; a valid 3x3 tap (kh, kw) is a row shift of kh*w + kw.
    Rows whose window crosses the image edge carry finite garbage and are
    never read at any valid pooled anchor (y, x even, <= 2*(hp-1))."""

    def kernel(x_ref, w1_ref, b1_ref, w2_ref, b2_ref,
               wf1_ref, bf1_ref, wf2_ref, bf2_ref, out_ref):
        # ---- conv1: single im2col matmul (bf16 LHS prepared on the host) ---
        y1 = jnp.dot(x_ref[...], w1_ref[...],
                     preferred_element_type=jnp.float32)          # (l1, 32)
        y1 = jnp.maximum(y1 + b1_ref[...], 0.0)
        y1_bf = y1.astype(jnp.bfloat16)                           # cast ONCE

        # ---- conv2: one lane-axis concat (K = 9*32 = 288), one matmul ------
        lhs2 = jnp.concatenate(
            [y1_bf[kh * w + kw: kh * w + kw + l2, :]
             for kh in range(3) for kw in range(3)], axis=1)      # (l2, 288)
        y2 = jnp.dot(lhs2, w2_ref[...],
                     preferred_element_type=jnp.float32) + b2_ref[...]  # (l2,64)

        # ---- 2x2/2 max-pool (ReLU commutes with max; applied after gather) -
        m1 = jnp.maximum(y2[0:l2 - 1, :], y2[1:l2, :])            # pair along W
        m2 = jnp.maximum(m1[0:lp, :], m1[w:w + lp, :])            # pair along H

        # ---- flatten: gather hp*wp anchor rows into one lane-dense row -----
        # column order (ph, pw, c); w_fc1 rows were permuted host-side to
        # match torch.flatten(x, 1)'s (c, ph, pw) order -> no transpose here.
        row_blocks = []
        for ph in range(hp):
            base = 2 * ph * w
            row_blocks.append(jnp.concatenate(
                [m2[base + 2 * pw: base + 2 * pw + 1, :] for pw in range(wp)],
                axis=1))                                          # (1, wp*64)
        flat = jnp.concatenate(row_blocks, axis=1)                # (1, 2304)
        flat_bf = jnp.maximum(flat, 0.0).astype(jnp.bfloat16)     # ReLU + cast

        # ---- fc1 + ReLU, fc2, log_softmax ----------------------------------
        hid = jnp.dot(flat_bf, wf1_ref[...],
                      preferred_element_type=jnp.float32) + bf1_ref[...]
        hid = jnp.maximum(hid, 0.0)
        logits = jnp.dot(hid.astype(jnp.bfloat16), wf2_ref[...],
                         preferred_element_type=jnp.float32) + bf2_ref[...]
        mx = jnp.max(logits, axis=1, keepdims=True)
        sh = logits - mx
        lse = jnp.log(jnp.sum(jnp.exp(sh), axis=1, keepdims=True))
        out_ref[0] = (sh - lse).astype(out_ref.dtype)             # (1, classes)

    return kernel


# --------------------------------------------------------------------------- #
# Host-side weight prep (one-time)
# --------------------------------------------------------------------------- #
def prepare_params(params, h, w):
    """bf16 MXU operands, conv weights flattened to (9*Cin, Cout) matching the
    im2col column order, and w_fc1 rows permuted from torch's (C,H,W) flatten
    order to the kernel's (H,W,C) gather order."""
    hp, wp = (h - 4) // 2, (w - 4) // 2
    cin = params["w_conv1"].shape[2]
    c1 = params["w_conv1"].shape[3]
    c2 = params["w_conv2"].shape[3]
    ph, pw_, c = jnp.meshgrid(jnp.arange(hp), jnp.arange(wp), jnp.arange(c2),
                              indexing="ij")
    perm = (c * (hp * wp) + ph * wp + pw_).reshape(-1)   # kernel col -> torch row
    return {
        "w1": params["w_conv1"].reshape(9 * cin, c1).astype(jnp.bfloat16),
        "b1": params["b_conv1"].astype(jnp.float32),
        "w2": params["w_conv2"].reshape(9 * c1, c2).astype(jnp.bfloat16),
        "b2": params["b_conv2"].astype(jnp.float32),
        "wf1": params["w_fc1"][perm, :].astype(jnp.bfloat16),
        "bf1": params["b_fc1"].astype(jnp.float32),
        "wf2": params["w_fc2"].astype(jnp.bfloat16),
        "bf2": params["b_fc2"].astype(jnp.float32),
    }


# --------------------------------------------------------------------------- #
# Forward wrapper
# --------------------------------------------------------------------------- #
def cnn_net_forward(x_nchw, kparams):
    n, cin, h, w = x_nchw.shape
    hp, wp, l1, l2, lp = _geometry(h, w)
    num_classes = kparams["wf2"].shape[1]

    # Host-side layout plumbing (fused under jit): NCHW -> per-image flattened
    # NHWC rows, zero-pad the row axis so every tap slice of length l1 is in
    # bounds, then im2col for conv1 (column order (kh, kw, c) matches w1).
    x_rows = jnp.transpose(x_nchw, (0, 2, 3, 1)).reshape(n, h * w, cin)
    pad = max(0, l1 + 2 * w + 2 - h * w)
    x_rows = jnp.pad(x_rows, ((0, 0), (0, pad), (0, 0)))
    taps = [x_rows[:, kh * w + kw: kh * w + kw + l1, :]
            for kh in range(3) for kw in range(3)]
    x_im2col = jnp.concatenate(taps, axis=2).astype(jnp.bfloat16)
    x_im2col = x_im2col.reshape(n * l1, 9 * cin)

    def _full_spec(arr):
        nd = arr.ndim
        return pl.BlockSpec(arr.shape, lambda i, _nd=nd: (0,) * _nd)

    kernel = _make_kernel(w, hp, wp, l2, lp)
    out = pl.pallas_call(
        kernel,
        out_shape=jax.ShapeDtypeStruct((n, 1, num_classes), jnp.float32),
        grid_spec=pltpu.PrefetchScalarGridSpec(
            num_scalar_prefetch=0,
            grid=(n,),                                     # one image per step
            in_specs=[
                pl.BlockSpec((l1, 9 * cin), lambda i: (i, 0)),   # im2col slab
                _full_spec(kparams["w1"]), _full_spec(kparams["b1"]),
                _full_spec(kparams["w2"]), _full_spec(kparams["b2"]),
                _full_spec(kparams["wf1"]), _full_spec(kparams["bf1"]),
                _full_spec(kparams["wf2"]), _full_spec(kparams["bf2"]),
            ],
            out_specs=pl.BlockSpec((1, 1, num_classes), lambda i: (i, 0, 0)),
        ),
        compiler_params=pltpu.CompilerParams(
            dimension_semantics=("parallel",)),            # v7x: 2 TCs split n
    )(x_im2col, kparams["w1"], kparams["b1"], kparams["w2"], kparams["b2"],
      kparams["wf1"], kparams["bf1"], kparams["wf2"], kparams["bf2"])
    return out.reshape(n, num_classes)


# --------------------------------------------------------------------------- #
# Pure-JAX reference (f32) for the correctness check
# --------------------------------------------------------------------------- #
def reference_forward(x_nchw, params):
    x = jnp.transpose(x_nchw, (0, 2, 3, 1))
    y = jax.lax.conv_general_dilated(
        x, params["w_conv1"], (1, 1), "VALID",
        dimension_numbers=("NHWC", "HWIO", "NHWC")) + params["b_conv1"][0]
    y = jax.nn.relu(y)
    y = jax.lax.conv_general_dilated(
        y, params["w_conv2"], (1, 1), "VALID",
        dimension_numbers=("NHWC", "HWIO", "NHWC")) + params["b_conv2"][0]
    y = jax.nn.relu(y)
    nb, hh, ww, c = y.shape
    y = y.reshape(nb, hh // 2, 2, ww // 2, 2, c).max(axis=(2, 4))
    y = jnp.transpose(y, (0, 3, 1, 2)).reshape(nb, -1)      # torch flatten order
    h1 = jax.nn.relu(y @ params["w_fc1"] + params["b_fc1"][0])
    logits = h1 @ params["w_fc2"] + params["b_fc2"][0]
    return jax.nn.log_softmax(logits, axis=1)


# --------------------------------------------------------------------------- #
if __name__ == "__main__":
    batch, channels, spatial = 2, 4, 16
    num_classes = 10
    pooled = (spatial - 4) // 2                              # 16 -> 14 -> 12 -> 6
    fc_size = 64 * pooled * pooled                           # 2304

    key = jax.random.PRNGKey(0)
    keys = jax.random.split(key, 9)

    def init(k, shape, fan_in):
        return (jax.random.normal(k, shape, jnp.float32) /
                jnp.sqrt(jnp.float32(fan_in))).astype(jnp.float32)

    params = {
        "w_conv1": init(keys[0], (3, 3, channels, 32), 9 * channels),
        "b_conv1": init(keys[1], (1, 32), 9 * channels),
        "w_conv2": init(keys[2], (3, 3, 32, 64), 9 * 32),
        "b_conv2": init(keys[3], (1, 64), 9 * 32),
        "w_fc1":   init(keys[4], (fc_size, 128), fc_size),
        "b_fc1":   init(keys[5], (1, 128), fc_size),
        "w_fc2":   init(keys[6], (128, num_classes), 128),
        "b_fc2":   init(keys[7], (1, num_classes), 128),
    }
    x = jax.random.normal(keys[8], (batch, channels, spatial, spatial), jnp.float32)

    kparams = prepare_params(params, spatial, spatial)       # host, one-time

    fwd = jax.jit(cnn_net_forward)
    out = jax.block_until_ready(fwd(x, kparams))
    ref = jax.block_until_ready(reference_forward(x, params))

    assert out.shape == (batch, num_classes)
    # bf16 MXU operands (f32 accumulation) vs an f32 reference: loose tolerance;
    # structural bugs would produce O(1) errors.
    if not jnp.allclose(out, ref, atol=3e-2, rtol=3e-2):
        raise AssertionError(
            f"mismatch vs reference, max abs diff = {jnp.max(jnp.abs(out - ref))}")
    print("KERNEL_OK")
</pallas_src>

<mosaic_0001>
module attributes {stable_mosaic.version = 11 : i64} {
  func.func @kernel(%arg0: i32, %arg1: memref<240x36xbf16, #tpu.memory_space<vmem>>, %arg2: memref<36x32xbf16, #tpu.memory_space<vmem>>, %arg3: memref<1x32xf32, #tpu.memory_space<vmem>>, %arg4: memref<288x64xbf16, #tpu.memory_space<vmem>>, %arg5: memref<1x64xf32, #tpu.memory_space<vmem>>, %arg6: memref<2304x128xbf16, #tpu.memory_space<vmem>>, %arg7: memref<1x128xf32, #tpu.memory_space<vmem>>, %arg8: memref<128x10xbf16, #tpu.memory_space<vmem>>, %arg9: memref<1x10xf32, #tpu.memory_space<vmem>>, %arg10: memref<1x1x10xf32, #tpu.memory_space<vmem>>) attributes {dimension_semantics = [#tpu.dimension_semantics<parallel>], iteration_bounds = array<i64: 2>, scalar_prefetch = 0 : i64, scratch_operands = 0 : i64, tpu.core_type = #tpu.core_type<tc>, window_params = [{transform_indices = @transform_0, window_bounds = array<i64: 240, 36>}, {pipeline_mode = #tpu.pipeline_mode<synchronous>, transform_indices = @transform_1, window_bounds = array<i64: 36, 32>}, {pipeline_mode = #tpu.pipeline_mode<synchronous>, transform_indices = @transform_2, window_bounds = array<i64: 1, 32>}, {pipeline_mode = #tpu.pipeline_mode<synchronous>, transform_indices = @transform_3, window_bounds = array<i64: 288, 64>}, {pipeline_mode = #tpu.pipeline_mode<synchronous>, transform_indices = @transform_4, window_bounds = array<i64: 1, 64>}, {pipeline_mode = #tpu.pipeline_mode<synchronous>, transform_indices = @transform_5, window_bounds = array<i64: 2304, 128>}, {pipeline_mode = #tpu.pipeline_mode<synchronous>, transform_indices = @transform_6, window_bounds = array<i64: 1, 128>}, {pipeline_mode = #tpu.pipeline_mode<synchronous>, transform_indices = @transform_7, window_bounds = array<i64: 128, 10>}, {pipeline_mode = #tpu.pipeline_mode<synchronous>, transform_indices = @transform_8, window_bounds = array<i64: 1, 10>}, {transform_indices = @transform_9, window_bounds = array<i64: 1, 1, 10>}]} {
    %c0 = arith.constant 0 : index
    %c0_0 = arith.constant 0 : index
    %0 = vector.load %arg1[%c0, %c0_0] : memref<240x36xbf16, #tpu.memory_space<vmem>>, vector<240x36xbf16>
    %c0_1 = arith.constant 0 : index
    %c0_2 = arith.constant 0 : index
    %1 = vector.load %arg2[%c0_1, %c0_2] : memref<36x32xbf16, #tpu.memory_space<vmem>>, vector<36x32xbf16>
    %cst = arith.constant dense<0.000000e+00> : vector<240x32xf32>
    %2 = tpu.matmul %0, %1, %cst {dimension_numbers = #tpu.dot_dimension_numbers<[1], [0], [0], [1], [0, 0, 1, 1], [], []>} : vector<240x36xbf16>, vector<36x32xbf16>, vector<240x32xf32> -> vector<240x32xf32>
    %c0_3 = arith.constant 0 : index
    %c0_4 = arith.constant 0 : index
    %3 = vector.load %arg3[%c0_3, %c0_4] : memref<1x32xf32, #tpu.memory_space<vmem>>, vector<1x32xf32>
    %4 = vector.broadcast %3 : vector<1x32xf32> to vector<240x32xf32>
    %5 = arith.addf %2, %4 : vector<240x32xf32>
    %cst_5 = arith.constant 0.000000e+00 : f32
    %6 = vector.broadcast %cst_5 : f32 to vector<240x32xf32>
    %7 = arith.maximumf %5, %6 : vector<240x32xf32>
    %8 = arith.truncf %7 : vector<240x32xf32> to vector<240x32xbf16>
    %9 = vector.extract_strided_slice %8 {offsets = [0, 0], sizes = [192, 32], strides = [1, 1]} : vector<240x32xbf16> to vector<192x32xbf16>
    %10 = vector.extract_strided_slice %8 {offsets = [1, 0], sizes = [192, 32], strides = [1, 1]} : vector<240x32xbf16> to vector<192x32xbf16>
    %11 = vector.extract_strided_slice %8 {offsets = [2, 0], sizes = [192, 32], strides = [1, 1]} : vector<240x32xbf16> to vector<192x32xbf16>
    %12 = vector.extract_strided_slice %8 {offsets = [16, 0], sizes = [192, 32], strides = [1, 1]} : vector<240x32xbf16> to vector<192x32xbf16>
    %13 = vector.extract_strided_slice %8 {offsets = [17, 0], sizes = [192, 32], strides = [1, 1]} : vector<240x32xbf16> to vector<192x32xbf16>
    %14 = vector.extract_strided_slice %8 {offsets = [18, 0], sizes = [192, 32], strides = [1, 1]} : vector<240x32xbf16> to vector<192x32xbf16>
    %15 = vector.extract_strided_slice %8 {offsets = [32, 0], sizes = [192, 32], strides = [1, 1]} : vector<240x32xbf16> to vector<192x32xbf16>
    %16 = vector.extract_strided_slice %8 {offsets = [33, 0], sizes = [192, 32], strides = [1, 1]} : vector<240x32xbf16> to vector<192x32xbf16>
    %17 = vector.extract_strided_slice %8 {offsets = [34, 0], sizes = [192, 32], strides = [1, 1]} : vector<240x32xbf16> to vector<192x32xbf16>
    %18 = tpu.concatenate %9, %10, %11, %12, %13, %14, %15, %16, %17 in 1 : vector<192x32xbf16>, vector<192x32xbf16>, vector<192x32xbf16>, vector<192x32xbf16>, vector<192x32xbf16>, vector<192x32xbf16>, vector<192x32xbf16>, vector<192x32xbf16>, vector<192x32xbf16> -> vector<192x288xbf16>
    %c0_6 = arith.constant 0 : index
    %c0_7 = arith.constant 0 : index
    %19 = vector.load %arg4[%c0_6, %c0_7] : memref<288x64xbf16, #tpu.memory_space<vmem>>, vector<288x64xbf16>
    %cst_8 = arith.constant dense<0.000000e+00> : vector<192x64xf32>
    %20 = tpu.matmul %18, %19, %cst_8 {dimension_numbers = #tpu.dot_dimension_numbers<[1], [0], [0], [1], [0, 0, 1, 1], [], []>} : vector<192x288xbf16>, vector<288x64xbf16>, vector<192x64xf32> -> vector<192x64xf32>
    %c0_9 = arith.constant 0 : index
    %c0_10 = arith.constant 0 : index
    %21 = vector.load %arg5[%c0_9, %c0_10] : memref<1x64xf32, #tpu.memory_space<vmem>>, vector<1x64xf32>
    %22 = vector.broadcast %21 : vector<1x64xf32> to vector<192x64xf32>
    %23 = arith.addf %20, %22 : vector<192x64xf32>
    %24 = vector.extract_strided_slice %23 {offsets = [0, 0], sizes = [191, 64], strides = [1, 1]} : vector<192x64xf32> to vector<191x64xf32>
    %25 = vector.extract_strided_slice %23 {offsets = [1, 0], sizes = [191, 64], strides = [1, 1]} : vector<192x64xf32> to vector<191x64xf32>
    %26 = arith.maximumf %24, %25 : vector<191x64xf32>
    %27 = vector.extract_strided_slice %26 {offsets = [0, 0], sizes = [175, 64], strides = [1, 1]} : vector<191x64xf32> to vector<175x64xf32>
    %28 = vector.extract_strided_slice %26 {offsets = [16, 0], sizes = [175, 64], strides = [1, 1]} : vector<191x64xf32> to vector<175x64xf32>
    %29 = arith.maximumf %27, %28 : vector<175x64xf32>
    %30 = vector.extract_strided_slice %29 {offsets = [0, 0], sizes = [1, 64], strides = [1, 1]} : vector<175x64xf32> to vector<1x64xf32>
    %31 = vector.extract_strided_slice %29 {offsets = [2, 0], sizes = [1, 64], strides = [1, 1]} : vector<175x64xf32> to vector<1x64xf32>
    %32 = vector.extract_strided_slice %29 {offsets = [4, 0], sizes = [1, 64], strides = [1, 1]} : vector<175x64xf32> to vector<1x64xf32>
    %33 = vector.extract_strided_slice %29 {offsets = [6, 0], sizes = [1, 64], strides = [1, 1]} : vector<175x64xf32> to vector<1x64xf32>
    %34 = vector.extract_strided_slice %29 {offsets = [8, 0], sizes = [1, 64], strides = [1, 1]} : vector<175x64xf32> to vector<1x64xf32>
    %35 = vector.extract_strided_slice %29 {offsets = [10, 0], sizes = [1, 64], strides = [1, 1]} : vector<175x64xf32> to vector<1x64xf32>
    %36 = tpu.concatenate %30, %31, %32, %33, %34, %35 in 1 : vector<1x64xf32>, vector<1x64xf32>, vector<1x64xf32>, vector<1x64xf32>, vector<1x64xf32>, vector<1x64xf32> -> vector<1x384xf32>
    %37 = vector.extract_strided_slice %29 {offsets = [32, 0], sizes = [1, 64], strides = [1, 1]} : vector<175x64xf32> to vector<1x64xf32>
    %38 = vector.extract_strided_slice %29 {offsets = [34, 0], sizes = [1, 64], strides = [1, 1]} : vector<175x64xf32> to vector<1x64xf32>
    %39 = vector.extract_strided_slice %29 {offsets = [36, 0], sizes = [1, 64], strides = [1, 1]} : vector<175x64xf32> to vector<1x64xf32>
    %40 = vector.extract_strided_slice %29 {offsets = [38, 0], sizes = [1, 64], strides = [1, 1]} : vector<175x64xf32> to vector<1x64xf32>
    %41 = vector.extract_strided_slice %29 {offsets = [40, 0], sizes = [1, 64], strides = [1, 1]} : vector<175x64xf32> to vector<1x64xf32>
    %42 = vector.extract_strided_slice %29 {offsets = [42, 0], sizes = [1, 64], strides = [1, 1]} : vector<175x64xf32> to vector<1x64xf32>
    %43 = tpu.concatenate %37, %38, %39, %40, %41, %42 in 1 : vector<1x64xf32>, vector<1x64xf32>, vector<1x64xf32>, vector<1x64xf32>, vector<1x64xf32>, vector<1x64xf32> -> vector<1x384xf32>
    %44 = vector.extract_strided_slice %29 {offsets = [64, 0], sizes = [1, 64], strides = [1, 1]} : vector<175x64xf32> to vector<1x64xf32>
    %45 = vector.extract_strided_slice %29 {offsets = [66, 0], sizes = [1, 64], strides = [1, 1]} : vector<175x64xf32> to vector<1x64xf32>
    %46 = vector.extract_strided_slice %29 {offsets = [68, 0], sizes = [1, 64], strides = [1, 1]} : vector<175x64xf32> to vector<1x64xf32>
    %47 = vector.extract_strided_slice %29 {offsets = [70, 0], sizes = [1, 64], strides = [1, 1]} : vector<175x64xf32> to vector<1x64xf32>
    %48 = vector.extract_strided_slice %29 {offsets = [72, 0], sizes = [1, 64], strides = [1, 1]} : vector<175x64xf32> to vector<1x64xf32>
    %49 = vector.extract_strided_slice %29 {offsets = [74, 0], sizes = [1, 64], strides = [1, 1]} : vector<175x64xf32> to vector<1x64xf32>
    %50 = tpu.concatenate %44, %45, %46, %47, %48, %49 in 1 : vector<1x64xf32>, vector<1x64xf32>, vector<1x64xf32>, vector<1x64xf32>, vector<1x64xf32>, vector<1x64xf32> -> vector<1x384xf32>
    %51 = vector.extract_strided_slice %29 {offsets = [96, 0], sizes = [1, 64], strides = [1, 1]} : vector<175x64xf32> to vector<1x64xf32>
    %52 = vector.extract_strided_slice %29 {offsets = [98, 0], sizes = [1, 64], strides = [1, 1]} : vector<175x64xf32> to vector<1x64xf32>
    %53 = vector.extract_strided_slice %29 {offsets = [100, 0], sizes = [1, 64], strides = [1, 1]} : vector<175x64xf32> to vector<1x64xf32>
    %54 = vector.extract_strided_slice %29 {offsets = [102, 0], sizes = [1, 64], strides = [1, 1]} : vector<175x64xf32> to vector<1x64xf32>
    %55 = vector.extract_strided_slice %29 {offsets = [104, 0], sizes = [1, 64], strides = [1, 1]} : vector<175x64xf32> to vector<1x64xf32>
    %56 = vector.extract_strided_slice %29 {offsets = [106, 0], sizes = [1, 64], strides = [1, 1]} : vector<175x64xf32> to vector<1x64xf32>
    %57 = tpu.concatenate %51, %52, %53, %54, %55, %56 in 1 : vector<1x64xf32>, vector<1x64xf32>, vector<1x64xf32>, vector<1x64xf32>, vector<1x64xf32>, vector<1x64xf32> -> vector<1x384xf32>
    %58 = vector.extract_strided_slice %29 {offsets = [128, 0], sizes = [1, 64], strides = [1, 1]} : vector<175x64xf32> to vector<1x64xf32>
    %59 = vector.extract_strided_slice %29 {offsets = [130, 0], sizes = [1, 64], strides = [1, 1]} : vector<175x64xf32> to vector<1x64xf32>
    %60 = vector.extract_strided_slice %29 {offsets = [132, 0], sizes = [1, 64], strides = [1, 1]} : vector<175x64xf32> to vector<1x64xf32>
    %61 = vector.extract_strided_slice %29 {offsets = [134, 0], sizes = [1, 64], strides = [1, 1]} : vector<175x64xf32> to vector<1x64xf32>
    %62 = vector.extract_strided_slice %29 {offsets = [136, 0], sizes = [1, 64], strides = [1, 1]} : vector<175x64xf32> to vector<1x64xf32>
    %63 = vector.extract_strided_slice %29 {offsets = [138, 0], sizes = [1, 64], strides = [1, 1]} : vector<175x64xf32> to vector<1x64xf32>
    %64 = tpu.concatenate %58, %59, %60, %61, %62, %63 in 1 : vector<1x64xf32>, vector<1x64xf32>, vector<1x64xf32>, vector<1x64xf32>, vector<1x64xf32>, vector<1x64xf32> -> vector<1x384xf32>
    %65 = vector.extract_strided_slice %29 {offsets = [160, 0], sizes = [1, 64], strides = [1, 1]} : vector<175x64xf32> to vector<1x64xf32>
    %66 = vector.extract_strided_slice %29 {offsets = [162, 0], sizes = [1, 64], strides = [1, 1]} : vector<175x64xf32> to vector<1x64xf32>
    %67 = vector.extract_strided_slice %29 {offsets = [164, 0], sizes = [1, 64], strides = [1, 1]} : vector<175x64xf32> to vector<1x64xf32>
    %68 = vector.extract_strided_slice %29 {offsets = [166, 0], sizes = [1, 64], strides = [1, 1]} : vector<175x64xf32> to vector<1x64xf32>
    %69 = vector.extract_strided_slice %29 {offsets = [168, 0], sizes = [1, 64], strides = [1, 1]} : vector<175x64xf32> to vector<1x64xf32>
    %70 = vector.extract_strided_slice %29 {offsets = [170, 0], sizes = [1, 64], strides = [1, 1]} : vector<175x64xf32> to vector<1x64xf32>
    %71 = tpu.concatenate %65, %66, %67, %68, %69, %70 in 1 : vector<1x64xf32>, vector<1x64xf32>, vector<1x64xf32>, vector<1x64xf32>, vector<1x64xf32>, vector<1x64xf32> -> vector<1x384xf32>
    %72 = tpu.concatenate %36, %43, %50, %57, %64, %71 in 1 : vector<1x384xf32>, vector<1x384xf32>, vector<1x384xf32>, vector<1x384xf32>, vector<1x384xf32>, vector<1x384xf32> -> vector<1x2304xf32>
    %cst_11 = arith.constant 0.000000e+00 : f32
    %73 = vector.broadcast %cst_11 : f32 to vector<1x2304xf32>
    %74 = arith.maximumf %72, %73 : vector<1x2304xf32>
    %75 = arith.truncf %74 : vector<1x2304xf32> to vector<1x2304xbf16>
    %c0_12 = arith.constant 0 : index
    %c0_13 = arith.constant 0 : index
    %76 = vector.load %arg6[%c0_12, %c0_13] : memref<2304x128xbf16, #tpu.memory_space<vmem>>, vector<2304x128xbf16>
    %cst_14 = arith.constant dense<0.000000e+00> : vector<1x128xf32>
    %77 = tpu.matmul %75, %76, %cst_14 {dimension_numbers = #tpu.dot_dimension_numbers<[1], [0], [0], [1], [0, 0, 1, 1], [], []>} : vector<1x2304xbf16>, vector<2304x128xbf16>, vector<1x128xf32> -> vector<1x128xf32>
    %c0_15 = arith.constant 0 : index
    %c0_16 = arith.constant 0 : index
    %78 = vector.load %arg7[%c0_15, %c0_16] : memref<1x128xf32, #tpu.memory_space<vmem>>, vector<1x128xf32>
    %79 = arith.addf %77, %78 : vector<1x128xf32>
    %cst_17 = arith.constant 0.000000e+00 : f32
    %80 = vector.broadcast %cst_17 : f32 to vector<1x128xf32>
    %81 = arith.maximumf %79, %80 : vector<1x128xf32>
    %82 = arith.truncf %81 : vector<1x128xf32> to vector<1x128xbf16>
    %c0_18 = arith.constant 0 : index
    %c0_19 = arith.constant 0 : index
    %83 = vector.load %arg8[%c0_18, %c0_19] : memref<128x10xbf16, #tpu.memory_space<vmem>>, vector<128x10xbf16>
    %cst_20 = arith.constant dense<0.000000e+00> : vector<1x10xf32>
    %84 = tpu.matmul %82, %83, %cst_20 {dimension_numbers = #tpu.dot_dimension_numbers<[1], [0], [0], [1], [0, 0, 1, 1], [], []>} : vector<1x128xbf16>, vector<128x10xbf16>, vector<1x10xf32> -> vector<1x10xf32>
    %c0_21 = arith.constant 0 : index
    %c0_22 = arith.constant 0 : index
    %85 = vector.load %arg9[%c0_21, %c0_22] : memref<1x10xf32, #tpu.memory_space<vmem>>, vector<1x10xf32>
    %86 = arith.addf %84, %85 : vector<1x10xf32>
    %cst_23 = arith.constant dense<0xFF800000> : vector<1xf32>
    %87 = vector.multi_reduction <maximumf>, %86, %cst_23 [1] : vector<1x10xf32> to vector<1xf32>
    %88 = vector.shape_cast %87 : vector<1xf32> to vector<1x1xf32>
    %89 = vector.broadcast %88 : vector<1x1xf32> to vector<1x10xf32>
    %90 = arith.subf %86, %89 : vector<1x10xf32>
    %91 = math.exp %90 : vector<1x10xf32>
    %cst_24 = arith.constant dense<0.000000e+00> : vector<1xf32>
    %92 = vector.multi_reduction <add>, %91, %cst_24 [1] : vector<1x10xf32> to vector<1xf32>
    %93 = vector.shape_cast %92 : vector<1xf32> to vector<1x1xf32>
    %94 = math.log %93 : vector<1x1xf32>
    %95 = vector.broadcast %94 : vector<1x1xf32> to vector<1x10xf32>
    %96 = arith.subf %90, %95 : vector<1x10xf32>
    %c0_25 = arith.constant 0 : index
    %c0_26 = arith.constant 0 : index
    %c0_27 = arith.constant 0 : index
    %97 = vector.load %arg10[%c0_25, %c0_26, %c0_27] : memref<1x1x10xf32, #tpu.memory_space<vmem>>, vector<1x1x10xf32>
    %98 = vector.shape_cast %97 : vector<1x1x10xf32> to vector<1x10xf32>
    %99 = vector.shape_cast %96 : vector<1x10xf32> to vector<1x1x10xf32>
    tpu.vector_store %arg10[%c0_25, %c0_26, %c0_27], %99 {strides = array<i32>} : memref<1x1x10xf32, #tpu.memory_space<vmem>>, vector<1x1x10xf32>,
    return
  }
  func.func @transform_0(%arg0: i32) -> (i32, i32) {
    %c0_i32 = arith.constant 0 : i32
    %c0_i32_0 = arith.constant 0 : i32
    return %arg0, %c0_i32 : i32, i32
  }
  func.func @transform_1(%arg0: i32) -> (i32, i32) {
    %c0_i32 = arith.constant 0 : i32
    %c0_i32_0 = arith.constant 0 : i32
    %c0_i32_1 = arith.constant 0 : i32
    return %c0_i32, %c0_i32_0 : i32, i32
  }
  func.func @transform_2(%arg0: i32) -> (i32, i32) {
    %c0_i32 = arith.constant 0 : i32
    %c0_i32_0 = arith.constant 0 : i32
    %c0_i32_1 = arith.constant 0 : i32
    return %c0_i32, %c0_i32_0 : i32, i32
  }
  func.func @transform_3(%arg0: i32) -> (i32, i32) {
    %c0_i32 = arith.constant 0 : i32
    %c0_i32_0 = arith.constant 0 : i32
    %c0_i32_1 = arith.constant 0 : i32
    return %c0_i32, %c0_i32_0 : i32, i32
  }
  func.func @transform_4(%arg0: i32) -> (i32, i32) {
    %c0_i32 = arith.constant 0 : i32
    %c0_i32_0 = arith.constant 0 : i32
    %c0_i32_1 = arith.constant 0 : i32
    return %c0_i32, %c0_i32_0 : i32, i32
  }
  func.func @transform_5(%arg0: i32) -> (i32, i32) {
    %c0_i32 = arith.constant 0 : i32
    %c0_i32_0 = arith.constant 0 : i32
    %c0_i32_1 = arith.constant 0 : i32
    return %c0_i32, %c0_i32_0 : i32, i32
  }
  func.func @transform_6(%arg0: i32) -> (i32, i32) {
    %c0_i32 = arith.constant 0 : i32
    %c0_i32_0 = arith.constant 0 : i32
    %c0_i32_1 = arith.constant 0 : i32
    return %c0_i32, %c0_i32_0 : i32, i32
  }
  func.func @transform_7(%arg0: i32) -> (i32, i32) {
    %c0_i32 = arith.constant 0 : i32
    %c0_i32_0 = arith.constant 0 : i32
    %c0_i32_1 = arith.constant 0 : i32
    return %c0_i32, %c0_i32_0 : i32, i32
  }
  func.func @transform_8(%arg0: i32) -> (i32, i32) {
    %c0_i32 = arith.constant 0 : i32
    %c0_i32_0 = arith.constant 0 : i32
    %c0_i32_1 = arith.constant 0 : i32
    return %c0_i32, %c0_i32_0 : i32, i32
  }
  func.func @transform_9(%arg0: i32) -> (i32, i32, i32) {
    %c0_i32 = arith.constant 0 : i32
    %c0_i32_0 = arith.constant 0 : i32
    %c0_i32_1 = arith.constant 0 : i32
    return %arg0, %c0_i32, %c0_i32_0 : i32, i32, i32
  }
}

</mosaic_0001>

<bundles_post_ra>
// kernel: cnn_net_forward.1
= control target key start
LH: loop header
LB: loop body
LE: loop exit
PB: predicated region body
PF: predicated region fallthrough
CT: control target
= control target key end

     0   :  { %14 = vsyncpa [#allocation3], 0  ;;  %s6110_s0 = inlined_call_operand.vmem [shape: bf16[480,36], index: 0, kind: input, shape index: {}]   ;;  %s6111_s1 = inlined_call_operand.vmem [shape: bf16[36,32], index: 1, kind: input, shape index: {}]   ;;  %s6112_s2 = inlined_call_operand.vmem [shape: f32[1,32], index: 2, kind: input, shape index: {}]   ;;  %s6113_s3 = inlined_call_operand.vmem [shape: bf16[288,64], index: 3, kind: input, shape index: {}]   ;;  %s6114_s4 = inlined_call_operand.vmem [shape: f32[1,64], index: 4, kind: input, shape index: {}]   ;;  %s6115_s5 = inlined_call_operand.vmem [shape: bf16[2304,128], index: 5, kind: input, shape index: {}]   ;;  %s6116_s6 = inlined_call_operand.vmem [shape: f32[1,128], index: 6, kind: input, shape index: {}]   ;;  %s6117_s7 = inlined_call_operand.vmem [shape: bf16[128,10], index: 7, kind: input, shape index: {}]   ;;  %s6118_s8 = inlined_call_operand.vmem [shape: f32[1,10], index: 8, kind: input, shape index: {}]   ;;  %s6119_s9 = inlined_call_operand.hbm [shape: f32[2,1,10], index: 9, kind: output, shape index: {}]  }
   0x1   :  { %16 = vsyncpa [#allocation3 + $0x1], 0  ;;  %s4698_s30 = smov 0   ;;  %s4700_s10 = smov 0  }
   0x2   :  { %s4702_s11 = smov 0   ;;  %s4704_s12 = smov 0  }
   0x3 LB: > { %s4719_s13 = sadd.s32 4294967295, %s4640_s12   ;;  %s3631_s14 = sadd.s32 4294967294, %s4640_s12   ;;  %s4640_s12 = sphi %s4704_s12, %s6125_s12   ;;  %s4636_s11 = sphi %s4702_s11, %s6124_s11   ;;  %s4632_s10 = sphi %s4700_s10, %s6123_s10   ;;  %s4628_s30 = sphi %s4698_s30, %s6122_s30  }
   0x4   : > { %s4723_s15 = sadd.s32 1, %s4640_s12   ;;  %s223_s16 = sadd.s32 1, %s4636_s11 }
   0x5   : > { %s220_s17 = ssub.s32 %s4640_s12, %s4723_s15  ;;  %p233_p0 = scmp.ne.s32.totalorder %s4636_s11, %s4632_s10 }
   0x6   : > { %p221_p1 = scmp.eq.s32.totalorder %s220_s17, 0  ;;  %p234_p2 = scmp.eq.s32.totalorder %s4719_s13, 1 }
   0x7   : > { %p239_p3 = scmp.ne.s32.totalorder %s4632_s10, %s4628_s30  ;;  %p240_p4 = scmp.eq.s32.totalorder %s3631_s14, 1 }
   0x8   : > { %s4734_s18 = scalar_select %p221_p1, %s4636_s11, %s223_s16  }
   0x9   : > { %p4736_p5 = por %p234_p2, %p233_p0  ;;  %p4740_p6 = por %p240_p4, %p239_p3 }
   0xa   : > { %p3634_p7 = scmp.ge.s32.totalorder %s4640_s12, 1  ;;  %p291_p8 = scmp.lt.s32.totalorder %s4640_s12, 3 }
   0xc   : > { %p292_p9 = pnand %p3634_p7, %p291_p8 }
   0xd   : > { %v4386_v0 = vld [vmem:[%s6111_s1] sm:$0xff] (!%p292_p9)   ;;  %v4642_v1 = vmov (!%p292_p9), 0.0   ;;  %v4387_v2 = vld [vmem:[%s6111_s1 + $0x8] sm:$0xff] (!%p292_p9)   ;;  %v4388_v3 = vld [vmem:[%s6111_s1 + $0x10] ss:$0 sps:$4 sm:$0x33] (!%p292_p9)  }
   0xe   : > { %295 = sbr.rel (%p292_p9) target bundleno = 1774 (0x6ee), region = 56  ;;  %4183 = vmatprep.subr.bf16.mxu0 (!%p292_p9), %v4642_v1  ;;  %vm4643_vm0 = vmmov (!%p292_p9), 0   ;;  %vm511_vm1 = vcmask (!%p292_p9), 1041408   ;;  %vm465_vm2 = vcmask (!%p292_p9), 293888   ;;  %v4404_v20 = vld [vmem:[%s6113_s3 + $0x40] sm:$0xff] (!%p292_p9)   ;;  %v4406_v24 = vld [vmem:[%s6113_s3 + $0x48] sm:$0xff] (!%p292_p9)  }
   0xf   : > { %4184 = vmatpush3.bf16.msra.mxu0 (!%p292_p9), %v4386_v0  ;;  %4189 = vmatprep.mubr.msk.bf16.mxu0 (!%p292_p9), %vm4643_vm0, %v4642_v1  ;;  %s326_s27 = smul.u32 (!%p292_p9), 30, %s4719_s13  ;;  %v513_v4 = vsel (!%p292_p9), %vm511_vm1, %v4388_v3, 0  ;;  %v4405_v21 = vld [vmem:[%s6113_s3] sm:$0xff] (!%p292_p9)   ;;  %v4407_v27 = vld [vmem:[%s6113_s3 + $0x8] sm:$0xff] (!%p292_p9)   ;;  %v4408_v31 = vld [vmem:[%s6113_s3 + $0x50] sm:$0xff] (!%p292_p9)   ;;  %vm851_vm3 = vcmask (!%p292_p9), 1046528  }
  0x10   : > { %4185 = vmatprep.subr.bf16.mxu0 (!%p292_p9), %v4642_v1  ;;  %v4833_v22 = vld [vmem:[%s6112_s2] ss:$0 sm:$0xff] (!%p292_p9)  ;;  %3874 = vmatprep.subr.bf16.mxu1 (!%p292_p9), %v4404_v20  ;;  %v4409_v34 = vld [vmem:[%s6113_s3 + $0x10] sm:$0xff] (!%p292_p9)   ;;  %v4410_v37 = vld [vmem:[%s6113_s3 + $0x58] sm:$0xff] (!%p292_p9)   ;;  %s4644_s17 = smov (!%p292_p9), 96   ;;  %s4645_s25 = smov (!%p292_p9), 64  }
  0x11   : > { %p327_p10 = scmp.lt.s32.totalorder (!%p292_p9), %s326_s27, 59  ;;  %3875 = vmatpush3.bf16.msra.mxu1 (!%p292_p9), %v4405_v21  ;;  %v4411_v40 = vld [vmem:[%s6113_s3 + $0x18] sm:$0xff] (!%p292_p9)   ;;  %v4412_v45 = vld [vmem:[%s6113_s3 + $0x60] sm:$0xff] (!%p292_p9)   ;;  %v4414_v53 = vld [vmem:[%s6113_s3 + $0x68] sm:$0xff] (!%p292_p9)   ;;  %vm713_vm4 = vsmask.f32 (!%p292_p9), 7424 }
  0x12   : > { %3876 = vmatprep.subr.bf16.mxu1 (!%p292_p9), %v4406_v24  ;;  %v4413_v48 = vld [vmem:[%s6113_s3 + $0x20] sm:$0xff] (!%p292_p9)   ;;  %v4415_v59 = vld [vmem:[%s6113_s3 + $0x28] sm:$0xff] (!%p292_p9)   ;;  %v4416_v3 = vld [vmem:[%s6113_s3 + $0x70] sm:$0xff] (!%p292_p9)   ;;  %vm1019_vm5 = vcmask (!%p292_p9), 261120   ;;  %vm1044_vm6 = vcmask (!%p292_p9), 523264   ;;  %vm1069_vm7 = vcmask (!%p292_p9), 785408  }
  0x13   : > { %4186 = vmatpush3.bf16.msra.mxu0 (!%p292_p9), %v4387_v2  ;;  %vm3549_vm8 = vcmask (!%p292_p9), 73728   ;;  %s324_s14 = sand.u32 (!%p292_p9), 1, %s4632_s10  }
  0x14   : > { %4187 = vmatprep.subr.bf16.mxu0 (!%p292_p9), %v4642_v1  ;;  %s325_s21 = scalar_lea.vmem (!%p292_p9), [#allocation2], %s324_s14  ;;  %s3564_s26 = scalar_lea.sflag (!%p292_p9), [#allocation3], %s324_s14 }
  0x15   : > { %s6127_s27 = smov (!%p327_p10, %s326_s27), 59  ;;  %3877 = vmatpush3.bf16.msra.mxu1 %v4407_v27 }
  0x16   : > { %s3635_s28 = sshll.u32 %s6127_s27, 2  ;;  %3878 = vmatprep.subr.bf16.mxu1 %v4408_v31 }
  0x17   : > { %4188 = vmatpush3.bf16.msra.mxu0 %v513_v4  ;;  %s4764_s16 = scalar_lea.vmem %s6110_s0, %s3635_s28  ;;  %s4646_s28 = smov 32  }
  0x18   : > { %v4389_v5 = vld [vmem:[%s4764_s16] sm:$0xff]   ;;  %v4390_v6 = vld [vmem:[%s4764_s16 + $0x8] sm:$0xff]   ;;  %v4391_v7 = vld [vmem:[%s4764_s16 + $0x10] sm:$0xff]  }
  0x19   : > { %v4392_v8 = vld [vmem:[%s4764_s16 + $0x18] sm:$0xff]   ;;  %v4393_v9 = vld [vmem:[%s4764_s16 + $0x20] sm:$0xff]   ;;  %v4394_v10 = vld [vmem:[%s4764_s16 + $0x28] sm:$0xff]   ;;  %3879 = vmatpush3.bf16.msra.mxu1 %v4409_v34 }
  0x1a   : > { %4190 = vmatmul.mubr.msk.bf16.vlgmr.msra.gmra.mrb[0].mxu0 %vm465_vm2, %v4389_v5  ;;  %v4395_v11 = vld [vmem:[%s4764_s16 + $0x30] sm:$0xff]   ;;  %v4396_v12 = vld [vmem:[%s4764_s16 + $0x38] sm:$0xff]   ;;  %v4397_v13 = vld [vmem:[%s4764_s16 + $0x40] sm:$0xff]   ;;  %3880 = vmatprep.subr.bf16.mxu1 %v4410_v37 }
  0x1b   : > { %4193 = vmatprep.mubr.msk.bf16.mxu0 %vm4643_vm0, %v4642_v1  ;;  %v4398_v14 = vld [vmem:[%s4764_s16 + $0x48] sm:$0xff]   ;;  %v4399_v15 = vld [vmem:[%s4764_s16 + $0x50] sm:$0xff]   ;;  %v4400_v16 = vld [vmem:[%s4764_s16 + $0x58] sm:$0xff]  }
  0x1c   : > { %v4401_v17 = vld [vmem:[%s4764_s16 + $0x60] sm:$0xff]   ;;  %v4402_v18 = vld [vmem:[%s4764_s16 + $0x68] sm:$0xff]   ;;  %v4403_v19 = vld [vmem:[%s4764_s16 + $0x70] sm:$0xff]   ;;  %s3853_s16 = sshll.u32 %s4719_s13, 4  ;;  %s4647_s13 = smov [#allocation2]  }
  0x1d   : > { %3881 = vmatpush3.bf16.msra.mxu1 %v4411_v40  ;;  %s6067_s24 = scalar_lea.hbm %s6119_s9, %s3853_s16  ;;  %s4582_s27 = sshll.u32 %s4647_s13, 4  ;;  %s4583_s27 = int_to_ptr.vmem [resolvable:$false] %s4582_s27 }
  0x1e   : > { %3882 = vmatprep.subr.bf16.mxu1 %v4412_v45 }
  0x21   : > { %3883 = vmatpush3.bf16.msra.mxu1 %v4413_v48 }
  0x22   : > { %4194 = vmatmul.mubr.msk.bf16.gmra.mrb[4].mxu0 %vm465_vm2, %v4390_v6  ;;  %3884 = vmatprep.subr.bf16.mxu1 %v4414_v53 }
  0x23   : > { %4197 = vmatprep.mubr.msk.bf16.mxu0 %vm4643_vm0, %v4642_v1 }
  0x25   : > { %3885 = vmatpush3.bf16.msra.mxu1 %v4415_v59 }
  0x26   : > { %3886 = vmatprep.subr.bf16.mxu1 %v4416_v3 }
  0x2a   : > { %4198 = vmatmul.mubr.msk.bf16.gmra.mrb[8].mxu0 %vm465_vm2, %v4391_v7  ;;  %v4417_v7 = vld [vmem:[%s6113_s3 + $0x30] sm:$0xff]  }
  0x2b   : > { %4201 = vmatprep.mubr.msk.bf16.mxu0 %vm4643_vm0, %v4642_v1  ;;  %3887 = vmatpush3.bf16.msra.mxu1 %v4417_v7 }
  0x32   : > { %4202 = vmatmul.mubr.msk.bf16.gmra.mrb[12].mxu0 %vm465_vm2, %v4392_v8 }
  0x33   : > { %4205 = vmatprep.mubr.msk.bf16.mxu0 %vm4643_vm0, %v4642_v1 }
  0x3a   : > { %4206 = vmatmul.mubr.msk.bf16.gmra.mrb[16].mxu0 %vm465_vm2, %v4393_v9 }
  0x3b   : > { %4209 = vmatprep.mubr.msk.bf16.mxu0 %vm4643_vm0, %v4642_v1 }
  0x42   : > { %4210 = vmatmul.mubr.msk.bf16.gmra.mrb[20].mxu0 %vm465_vm2, %v4394_v10  ;;  %v4418_v10 = vld [vmem:[%s6113_s3 + $0x78] sm:$0xff]  }
  0x43   : > { %4213 = vmatprep.mubr.msk.bf16.mxu0 %vm4643_vm0, %v4642_v1  ;;  %3888 = vmatprep.subr.bf16.mxu1 %v4418_v10 }
  0x4a   : > { %4214 = vmatmul.mubr.msk.bf16.gmra.mrb[24].mxu0 %vm465_vm2, %v4395_v11 }
  0x4b   : > { %4217 = vmatprep.mubr.msk.bf16.mxu0 %vm4643_vm0, %v4642_v1 }
  0x52   : > { %4218 = vmatmul.mubr.msk.bf16.gmra.mrb[28].mxu0 %vm465_vm2, %v4396_v12 }
  0x53   : > { %4221 = vmatprep.mubr.msk.bf16.mxu0 %vm4643_vm0, %v4642_v1 }
  0x5a   : > { %4222 = vmatmul.mubr.msk.bf16.gmra.mrb[32].mxu0 %vm465_vm2, %v4397_v13 }
  0x5b   : > { %4225 = vmatprep.mubr.msk.bf16.mxu0 %vm4643_vm0, %v4642_v1 }
  0x62   : > { %4226 = vmatmul.mubr.msk.bf16.gmra.mrb[36].mxu0 %vm465_vm2, %v4398_v14  ;;  %v4419_v14 = vld [vmem:[%s6113_s3 + $0x38] sm:$0xff]  }
  0x63   : > { %4229 = vmatprep.mubr.msk.bf16.mxu0 %vm4643_vm0, %v4642_v1  ;;  %3889 = vmatpush3.bf16.msra.mxu1 %v4419_v14 }
  0x6a   : > { %4230 = vmatmul.mubr.msk.bf16.gmra.mrb[40].mxu0 %vm465_vm2, %v4399_v15 }
  0x6b   : > { %4233 = vmatprep.mubr.msk.bf16.mxu0 %vm4643_vm0, %v4642_v1 }
  0x72   : > { %4234 = vmatmul.mubr.msk.bf16.gmra.mrb[44].mxu0 %vm465_vm2, %v4400_v16 }
  0x73   : > { %4237 = vmatprep.mubr.msk.bf16.mxu0 %vm4643_vm0, %v4642_v1 }
  0x7a   : > { %4238 = vmatmul.mubr.msk.bf16.gmra.mrb[48].mxu0 %vm465_vm2, %v4401_v17 }
  0x7b   : > { %4241 = vmatprep.mubr.msk.bf16.mxu0 %vm4643_vm0, %v4642_v1 }
  0x82   : > { %4242 = vmatmul.mubr.msk.bf16.gmra.mrb[52].mxu0 %vm465_vm2, %v4402_v18 }
  0x83   : > { %4245 = vmatprep.mubr.msk.bf16.mxu0 %vm4643_vm0, %v4642_v1 }
  0x8a   : > { %4246 = vmatmul.mubr.msk.bf16.gmra.mrb[56].mxu0 %vm465_vm2, %v4403_v19 }
  0xed   : > { %v549_v23 = vpop.f32.mrb[0].mxu0 }
  0xee   : > { %v550_v25 = vadd.f32 %v4833_v22, %v549_v23  ;;  %v4191_v26 = vpop.f32.mrb[1].mxu0 }
  0xef   : > { %v552_v28 = vpop.f32.mrb[2].mxu0 }
  0xf0   : > { %v553_v29 = vadd.f32 %v4833_v22, %v552_v28  ;;  %v4192_v30 = vpop.f32.mrb[3].mxu0  ;;  %v668_v32 = vmax.f32 %v550_v25, 0.0 }
  0xf2   : > { %v669_v33 = vmax.f32 %v553_v29, 0.0 }
  0xf4   : > { %v4849_v35 = vpack.c.bf16 %v669_v33, %v668_v32 }
  0xf5   : > { %v557_v36 = vpop.f32.mrb[4].mxu0 }
  0xf6   : > { %v558_v38 = vadd.f32 %v4833_v22, %v557_v36  ;;  %v4195_v39 = vpop.f32.mrb[5].mxu0  ;;  %v717_v44 = vshll.u32 %v4849_v35, 16  ;;  %v852_v52 = vrot.slane %v4849_v35, 1  ;;  %v715_v57 = vshrl.u32 %v4849_v35, 16 }
  0xf7   : > { %v560_v41 = vpop.f32.mrb[6].mxu0 }
  0xf8   : > { %v561_v42 = vadd.f32 %v4833_v22, %v560_v41  ;;  %v4196_v43 = vpop.f32.mrb[7].mxu0  ;;  %v670_v46 = vmax.f32 %v558_v38, 0.0  ;;  %v719_v50 = vrot.slane %v717_v44, 1 }
  0xfa   : > { %v671_v47 = vmax.f32 %v561_v42, 0.0  ;;  %v720_v0 = vor.u32 %v719_v50, %v715_v57 }
  0xfc   : > { %v4866_v49 = vpack.c.bf16 %v671_v47, %v670_v46 }
  0xfd   : > { %v565_v51 = vpop.f32.mrb[8].mxu0 }
  0xfe   : > { %v566_v54 = vadd.f32 %v4833_v22, %v565_v51  ;;  %901 = vrot.lane.b32.xlu1 %v4866_v49, %s4644_s17  ;;  %v4199_v55 = vpop.f32.mrb[9].mxu0  ;;  %v853_v56 = vrot.slane %v4866_v49, 1  ;;  %v722_v58 = vshll.u32 %v4866_v49, 16  ;;  %v726_v25 = vshrl.u32 %v4866_v49, 16 }
  0xff   : > { %v568_v60 = vpop.f32.mrb[10].mxu0 }
 0x100   : > { %v569_v61 = vadd.f32 %v4833_v22, %v568_v60  ;;  %v4200_v62 = vpop.f32.mrb[11].mxu0  ;;  %v854_v63 = vsel %vm851_vm3, %v852_v52, %v853_v56  ;;  %v724_v2 = vrot.slane %v722_v58, 1  ;;  %v672_v4 = vmax.f32 %v566_v54, 0.0 }
 0x102   : > { %v673_v5 = vmax.f32 %v569_v61, 0.0  ;;  %877 = vrot.lane.b32.xlu1 %v854_v63, %s4645_s25  ;;  %v725_v6 = vsel %vm713_vm4, %v720_v0, %v724_v2  ;;  %v728_v32 = vor.u32 %v726_v25, %v724_v2 }
 0x103   : > { %814 = vrot.lane.b32.xlu0 %v725_v6, %s4646_s28 }
 0x104   : > { %v4892_v8 = vpack.c.bf16 %v673_v5, %v672_v4 }
 0x105   : > { %v573_v9 = vpop.f32.mrb[12].mxu0 }
 0x106   : > { %v574_v11 = vadd.f32 %v4833_v22, %v573_v9  ;;  %960 = vrot.lane.b32.xlu1 %v4892_v8, %s4645_s25  ;;  %v4203_v12 = vpop.f32.mrb[13].mxu0  ;;  %v855_v13 = vrot.slane %v4892_v8, 1  ;;  %v730_v19 = vshll.u32 %v4892_v8, 16  ;;  %v734_v39 = vshrl.u32 %v4892_v8, 16 }
 0x107   : > { %v576_v15 = vpop.f32.mrb[14].mxu0 }
 0x108   : > { %v577_v16 = vadd.f32 %v4833_v22, %v576_v15  ;;  %v4204_v17 = vpop.f32.mrb[15].mxu0  ;;  %v856_v18 = vsel %vm851_vm3, %v853_v56, %v855_v13  ;;  %v674_v20 = vmax.f32 %v574_v11, 0.0  ;;  %v732_v26 = vrot.slane %v730_v19, 1 }
 0x109   : > { %936 = vrot.lane.b32.xlu0 %v856_v18, %s4646_s28 }
 0x10a   : > { %v675_v21 = vmax.f32 %v577_v16, 0.0  ;;  %903 = vrot.lane.b32.xlu1 %v4892_v8, %s4644_s17  ;;  %v4924_v38 = vsel %vm713_vm4, %v728_v32, %v732_v26  ;;  %v736_v42 = vor.u32 %v734_v39, %v732_v26 }
 0x10c   : > { %v4910_v23 = vpack.c.bf16 %v675_v21, %v674_v20 }
 0x10d   : > { %v581_v24 = vpop.f32.mrb[16].mxu0 }
 0x10e   : > { %v582_v27 = vadd.f32 %v4833_v22, %v581_v24  ;;  %879 = vrot.lane.b32.xlu1 %v856_v18, %s4645_s25  ;;  %962 = vrot.lane.b32.xlu0 %v4910_v23, %s4645_s25  ;;  %v4207_v28 = vpop.f32.mrb[17].mxu0  ;;  %v857_v29 = vrot.slane %v4910_v23, 1  ;;  %v738_v30 = vshll.u32 %v4910_v23, 16  ;;  %v742_v59 = vshrl.u32 %v4910_v23, 16 }
 0x10f   : > { %v584_v31 = vpop.f32.mrb[18].mxu0 }
 0x110   : > { %v676_v33 = vmax.f32 %v582_v27, 0.0  ;;  %v585_v34 = vadd.f32 %v4833_v22, %v584_v31  ;;  %v4208_v36 = vpop.f32.mrb[19].mxu0  ;;  %v4921_v37 = vsel %vm851_vm3, %v855_v13, %v857_v29  ;;  %v740_v40 = vrot.slane %v738_v30, 1  ;;  %v4998_v30 = vld [vmem:[%s6113_s3 + $0x80] sm:$0xff]  }
 0x111   : > { %4249 = vmatprep.subr.bf16.mxu1 %v4998_v30 }
 0x112   : > { %v677_v41 = vmax.f32 %v585_v34, 0.0  ;;  %816 = vrot.lane.b32.xlu1 %v4924_v38, %s4646_s28  ;;  %938 = vrot.lane.b32.xlu0 %v4921_v37, %s4646_s28  ;;  %v4934_v45 = vsel %vm713_vm4, %v736_v42, %v740_v40  ;;  %v744_v0 = vor.u32 %v742_v59, %v740_v40 }
 0x114   : > { %v4931_v43 = vpack.c.bf16 %v677_v41, %v676_v33 }
 0x115   : > { %v589_v44 = vpop.f32.mrb[20].mxu0 }
 0x116   : > { %v590_v46 = vadd.f32 %v4833_v22, %v589_v44  ;;  %905 = vrot.lane.b32.xlu1 %v4910_v23, %s4644_s17  ;;  %992 = vrot.lane.b32.xlu0 %v4934_v45, %s4644_s17  ;;  %v4211_v47 = vpop.f32.mrb[21].mxu0  ;;  %v859_v53 = vrot.slane %v4931_v43, 1  ;;  %v746_v54 = vshll.u32 %v4931_v43, 16  ;;  %v750_v15 = vshrl.u32 %v4931_v43, 16 }
 0x117   : > { %v592_v48 = vpop.f32.mrb[22].mxu0 }
 0x118   : > { %v678_v50 = vmax.f32 %v590_v46, 0.0  ;;  %v593_v51 = vadd.f32 %v4833_v22, %v592_v48  ;;  %v4212_v52 = vpop.f32.mrb[23].mxu0  ;;  %v4951_v58 = vsel %vm851_vm3, %v857_v29, %v859_v53  ;;  %v748_v60 = vrot.slane %v746_v54, 1 }
 0x11a   : > { %v679_v55 = vmax.f32 %v593_v51, 0.0  ;;  %881 = vrot.lane.b32.xlu1 %v4921_v37, %s4645_s25  ;;  %964 = vrot.lane.b32.xlu0 %v4931_v43, %s4645_s25  ;;  %v4961_v5 = vsel %vm713_vm4, %v744_v0, %v748_v60  ;;  %v752_v24 = vor.u32 %v750_v15, %v748_v60 }
 0x11c   : > { %v4948_v56 = vpack.c.bf16 %v679_v55, %v678_v50 }
 0x11d   : > { %v597_v57 = vpop.f32.mrb[24].mxu0 }
 0x11e   : > { %v598_v61 = vadd.f32 %v4833_v22, %v597_v57  ;;  %818 = vrot.lane.b32.xlu1 %v4934_v45, %s4646_s28  ;;  %940 = vrot.lane.b32.xlu0 %v4951_v58, %s4646_s28  ;;  %v4215_v62 = vpop.f32.mrb[25].mxu0  ;;  %v861_v10 = vrot.slane %v4948_v56, 1  ;;  %v754_v11 = vshll.u32 %v4948_v56, 16  ;;  %v758_v41 = vshrl.u32 %v4948_v56, 16 }
 0x11f   : > { %v600_v63 = vpop.f32.mrb[26].mxu0 }
 0x120   : > { %v680_v2 = vmax.f32 %v598_v61, 0.0  ;;  %v601_v3 = vadd.f32 %v4833_v22, %v600_v63  ;;  %v4216_v4 = vpop.f32.mrb[27].mxu0  ;;  %v4979_v19 = vsel %vm851_vm3, %v859_v53, %v861_v10  ;;  %v756_v20 = vrot.slane %v754_v11, 1 }
 0x122   : > { %v681_v6 = vmax.f32 %v601_v3, 0.0  ;;  %907 = vrot.lane.b32.xlu1 %v4931_v43, %s4644_s17  ;;  %994 = vrot.lane.b32.xlu0 %v4961_v5, %s4644_s17  ;;  %v4988_v26 = vsel %vm713_vm4, %v752_v24, %v756_v20  ;;  %v760_v51 = vor.u32 %v758_v41, %v756_v20 }
 0x124   : > { %v4967_v7 = vpack.c.bf16 %v681_v6, %v680_v2 }
 0x125   : > { %v605_v9 = vpop.f32.mrb[28].mxu0 }
 0x126   : > { %883 = vrot.lane.b32.xlu1 %v4951_v58, %s4645_s25  ;;  %966 = vrot.lane.b32.xlu0 %v4948_v56, %s4645_s25  ;;  %v606_v12 = vadd.f32 %v4833_v22, %v605_v9  ;;  %v4219_v13 = vpop.f32.mrb[29].mxu0  ;;  %v863_v36 = vrot.slane %v4967_v7, 1  ;;  %v762_v39 = vshll.u32 %v4967_v7, 16  ;;  %v766_v62 = vshrl.u32 %v4967_v7, 16 }
 0x127   : > { %v608_v14 = vpop.f32.mrb[30].mxu0 }
 0x128   : > { %v682_v16 = vmax.f32 %v606_v12, 0.0  ;;  %v609_v17 = vadd.f32 %v4833_v22, %v608_v14  ;;  %v4220_v18 = vpop.f32.mrb[31].mxu0  ;;  %v5012_v44 = vsel %vm851_vm3, %v861_v10, %v863_v36  ;;  %v764_v46 = vrot.slane %v762_v39, 1 }
 0x12a   : > { %v683_v21 = vmax.f32 %v609_v17, 0.0  ;;  %820 = vrot.lane.b32.xlu1 %v4961_v5, %s4646_s28  ;;  %942 = vrot.lane.b32.xlu0 %v4979_v19, %s4646_s28  ;;  %v5021_v57 = vsel %vm713_vm4, %v760_v51, %v764_v46  ;;  %v768_v12 = vor.u32 %v766_v62, %v764_v46 }
 0x12c   : > { %v4985_v25 = vpack.c.bf16 %v683_v21, %v682_v16 }
 0x12d   : > { %v613_v27 = vpop.f32.mrb[32].mxu0 }
 0x12e   : > { %909 = vrot.lane.b32.xlu1 %v4948_v56, %s4644_s17  ;;  %996 = vrot.lane.b32.xlu0 %v4988_v26, %s4644_s17  ;;  %v614_v28 = vadd.f32 %v4833_v22, %v613_v27  ;;  %v4223_v29 = vpop.f32.mrb[33].mxu0  ;;  %v865_v61 = vrot.slane %v4985_v25, 1  ;;  %v770_v63 = vshll.u32 %v4985_v25, 16 }
 0x12f   : > { %v616_v31 = vpop.f32.mrb[34].mxu0 }
 0x130   : > { %v684_v32 = vmax.f32 %v614_v28, 0.0  ;;  %v617_v33 = vadd.f32 %v4833_v22, %v616_v31  ;;  %v4224_v34 = vpop.f32.mrb[35].mxu0  ;;  %v5039_v11 = vsel %vm851_vm3, %v863_v36, %v865_v61  ;;  %v772_v13 = vrot.slane %v770_v63, 1 }
 0x131   : > { %v774_v31 = vshrl.u32 %v4985_v25, 16 }
 0x132   : > { %885 = vrot.lane.b32.xlu1 %v4979_v19, %s4645_s25  ;;  %968 = vrot.lane.b32.xlu0 %v4967_v7, %s4645_s25  ;;  %v685_v40 = vmax.f32 %v617_v33, 0.0  ;;  %v5048_v16 = vsel %vm713_vm4, %v768_v12, %v772_v13 }
 0x133   : > { %v776_v39 = vor.u32 %v774_v31, %v772_v13 }
 0x134   : > { %v5009_v42 = vpack.c.bf16 %v685_v40, %v684_v32 }
 0x135   : > { %v621_v47 = vpop.f32.mrb[36].mxu0 }
 0x136   : > { %822 = vrot.lane.b32.xlu1 %v4988_v26, %s4646_s28  ;;  %944 = vrot.lane.b32.xlu0 %v5012_v44, %s4646_s28  ;;  %v622_v48 = vadd.f32 %v4833_v22, %v621_v47  ;;  %v4227_v50 = vpop.f32.mrb[37].mxu0  ;;  %v867_v29 = vrot.slane %v5009_v42, 1  ;;  %v778_v32 = vshll.u32 %v5009_v42, 16 }
 0x137   : > { %v624_v52 = vpop.f32.mrb[38].mxu0 }
 0x138   : > { %v686_v53 = vmax.f32 %v622_v48, 0.0  ;;  %v625_v54 = vadd.f32 %v4833_v22, %v624_v52  ;;  %v4228_v55 = vpop.f32.mrb[39].mxu0  ;;  %v5066_v36 = vsel %vm851_vm3, %v865_v61, %v867_v29  ;;  %v780_v40 = vrot.slane %v778_v32, 1 }
 0x139   : > { %v782_v61 = vshrl.u32 %v5009_v42, 16 }
 0x13a   : > { %911 = vrot.lane.b32.xlu1 %v4967_v7, %s4644_s17  ;;  %998 = vrot.lane.b32.xlu0 %v5021_v57, %s4644_s17  ;;  %v687_v59 = vmax.f32 %v625_v54, 0.0 }
 0x13b   : > { %v784_v13 = vor.u32 %v782_v61, %v780_v40 }
 0x13c   : > { %v5027_v60 = vpack.c.bf16 %v687_v59, %v686_v53  ;;  %v5075_v53 = vsel %vm713_vm4, %v776_v39, %v780_v40 }
 0x13d   : > { %v629_v0 = vpop.f32.mrb[40].mxu0 }
 0x13e   : > { %887 = vrot.lane.b32.xlu1 %v5012_v44, %s4645_s25  ;;  %970 = vrot.lane.b32.xlu0 %v4985_v25, %s4645_s25  ;;  %v630_v2 = vadd.f32 %v4833_v22, %v629_v0  ;;  %v4231_v3 = vpop.f32.mrb[41].mxu0  ;;  %v869_v59 = vrot.slane %v5027_v60, 1  ;;  %v786_v62 = vshll.u32 %v5027_v60, 16 }
 0x13f   : > { %v632_v4 = vpop.f32.mrb[42].mxu0 }
 0x140   : > { %v688_v6 = vmax.f32 %v630_v2, 0.0  ;;  %v633_v9 = vadd.f32 %v4833_v22, %v632_v4  ;;  %v4232_v10 = vpop.f32.mrb[43].mxu0  ;;  %v5094_v12 = vsel %vm851_vm3, %v867_v29, %v869_v59 }
 0x142   : > { %824 = vrot.lane.b32.xlu1 %v5021_v57, %s4646_s28  ;;  %946 = vrot.lane.b32.xlu0 %v5039_v11, %s4646_s28  ;;  %v689_v14 = vmax.f32 %v633_v9, 0.0 }
 0x144   : > { %v5045_v15 = vpack.c.bf16 %v689_v14, %v688_v6  ;;  %v788_v14 = vrot.slane %v786_v62, 1 }
 0x145   : > { %v637_v17 = vpop.f32.mrb[44].mxu0 }
 0x146   : > { %913 = vrot.lane.b32.xlu1 %v4985_v25, %s4644_s17  ;;  %1000 = vrot.lane.b32.xlu0 %v5048_v16, %s4644_s17  ;;  %v638_v18 = vadd.f32 %v4833_v22, %v637_v17  ;;  %v4235_v20 = vpop.f32.mrb[45].mxu0 }
 0x147   : > { %v640_v21 = vpop.f32.mrb[46].mxu0 }
 0x148   : > { %v690_v24 = vmax.f32 %v638_v18, 0.0  ;;  %v641_v27 = vadd.f32 %v4833_v22, %v640_v21  ;;  %v4236_v28 = vpop.f32.mrb[47].mxu0 }
 0x14a   : > { %889 = vrot.lane.b32.xlu1 %v5039_v11, %s4645_s25  ;;  %972 = vrot.lane.b32.xlu0 %v5009_v42, %s4645_s25  ;;  %v691_v33 = vmax.f32 %v641_v27, 0.0 }
 0x14c   : > { %v5063_v34 = vpack.c.bf16 %v691_v33, %v690_v24  ;;  %v5106_v24 = vsel %vm713_vm4, %v784_v13, %v788_v14 }
 0x14d   : > { %v645_v41 = vpop.f32.mrb[48].mxu0 }
 0x14e   : > { %826 = vrot.lane.b32.xlu1 %v5048_v16, %s4646_s28  ;;  %948 = vrot.lane.b32.xlu0 %v5066_v36, %s4646_s28  ;;  %v646_v46 = vadd.f32 %v4833_v22, %v645_v41  ;;  %v4239_v47 = vpop.f32.mrb[49].mxu0 }
 0x14f   : > { %v648_v48 = vpop.f32.mrb[50].mxu0 }
 0x150   : > { %v692_v50 = vmax.f32 %v646_v46, 0.0  ;;  %v649_v51 = vadd.f32 %v4833_v22, %v648_v48  ;;  %v4240_v52 = vpop.f32.mrb[51].mxu0 }
 0x151   : > { %v790_v52 = vshrl.u32 %v5027_v60, 16 }
 0x152   : > { %915 = vrot.lane.b32.xlu1 %v5009_v42, %s4644_s17  ;;  %1002 = vrot.lane.b32.xlu0 %v5075_v53, %s4644_s17  ;;  %v693_v54 = vmax.f32 %v649_v51, 0.0  ;;  %v871_v51 = vrot.slane %v5045_v15, 1 }
 0x154   : > { %v5081_v55 = vpack.c.bf16 %v693_v54, %v692_v50  ;;  %v794_v54 = vshll.u32 %v5045_v15, 16 }
 0x155   : > { %v653_v63 = vpop.f32.mrb[52].mxu0 }
 0x156   : > { %891 = vrot.lane.b32.xlu1 %v5066_v36, %s4645_s25  ;;  %974 = vrot.lane.b32.xlu0 %v5027_v60, %s4645_s25  ;;  %v654_v0 = vadd.f32 %v4833_v22, %v653_v63  ;;  %v4243_v2 = vpop.f32.mrb[53].mxu0  ;;  %v810_v10 = vshll.u32 %v5081_v55, 16  ;;  %v925_v18 = vshrl.u32 %v5081_v55, 16  ;;  %v875_v28 = vrot.slane %v5081_v55, 1 }
 0x157   : > { %v656_v3 = vpop.f32.mrb[54].mxu0  ;;  %v792_v2 = vor.u32 %v790_v52, %v788_v14  ;;  %v873_v14 = vrot.slane %v5063_v34, 1 }
 0x158   : > { %v694_v4 = vmax.f32 %v654_v0, 0.0  ;;  %v657_v6 = vadd.f32 %v4833_v22, %v656_v3  ;;  %v4244_v9 = vpop.f32.mrb[55].mxu0  ;;  %v5103_v21 = vrot.slane %v810_v10, 1  ;;  %v5133_v0 = vsel %vm851_vm3, %v869_v59, %v871_v51 }
 0x159   : > { %v796_v3 = vrot.slane %v794_v54, 1  ;;  %v5179_v52 = vsel %vm851_vm3, %v873_v14, %v875_v28 }
 0x15a   : > { %828 = vrot.lane.b32.xlu1 %v5075_v53, %s4646_s28  ;;  %950 = vrot.lane.b32.xlu0 %v5094_v12, %s4646_s28  ;;  %v695_v17 = vmax.f32 %v657_v6, 0.0  ;;  %v927_v33 = vor.u32 %v925_v18, %v5103_v21  ;;  %v798_v18 = vshrl.u32 %v5045_v15, 16 }
 0x15c   : > { %v5101_v20 = vpack.c.bf16 %v695_v17, %v694_v4  ;;  %v5143_v17 = vsel %vm713_vm4, %v792_v2, %v796_v3 }
 0x15d   : > { %v661_v27 = vpop.f32.mrb[56].mxu0 }
 0x15e   : > { %917 = vrot.lane.b32.xlu1 %v5027_v60, %s4644_s17  ;;  %1004 = vrot.lane.b32.xlu0 %v5106_v24, %s4644_s17  ;;  %v662_v29 = vadd.f32 %v4833_v22, %v661_v27  ;;  %v4247_v31 = vpop.f32.mrb[57].mxu0  ;;  %v934_v32 = vrot.slane %v5101_v20, 1  ;;  %v929_v39 = vshll.u32 %v5101_v20, 16  ;;  %v984_v62 = vshrl.u32 %v5101_v20, 16 }
 0x15f   : > { %v664_v40 = vpop.f32.mrb[58].mxu0  ;;  %v802_v27 = vshll.u32 %v5063_v34, 16  ;;  %v5160_v31 = vsel %vm851_vm3, %v871_v51, %v873_v14  ;;  %v4421_v14 = vld [vmem:[%s6113_s3 + $0x88] sm:$0xff]  }
 0x160   : > { %v696_v41 = vmax.f32 %v662_v29, 0.0  ;;  %v665_v46 = vadd.f32 %v4833_v22, %v664_v40  ;;  %v4248_v47 = vpop.f32.mrb[59].mxu0  ;;  %v5119_v48 = vsel %vm851_vm3, %v875_v28, %v934_v32  ;;  %v931_v50 = vrot.slane %v929_v39, 1 }
 0x161   : > { %v806_v47 = vshrl.u32 %v5063_v34, 16 }
 0x162   : > { %893 = vrot.lane.b32.xlu1 %v5094_v12, %s4645_s25  ;;  %976 = vrot.lane.b32.xlu0 %v5045_v15, %s4645_s25  ;;  %v697_v61 = vmax.f32 %v665_v46, 0.0  ;;  %v5129_v22 = vsel %vm713_vm4, %v927_v33, %v931_v50  ;;  %v986_v9 = vor.u32 %v984_v62, %v931_v50  ;;  %v804_v33 = vrot.slane %v802_v27, 1 }
 0x164   : > { %v712_v63 = vpack.c.bf16 %v697_v61, %v696_v41  ;;  %v808_v54 = vor.u32 %v806_v47, %v804_v33 }
 0x166   : > { %830 = vrot.lane.b32.xlu1 %v5106_v24, %s4646_s28  ;;  %952 = vrot.lane.b32.xlu0 %v5133_v0, %s4646_s28  ;;  %v988_v4 = vshll.u32 %v712_v63, 16  ;;  %v1017_v6 = vrot.slane %v712_v63, 1  ;;  %v5187_v63 = vsel %vm713_vm4, %v808_v54, %v5103_v21 }
 0x168   : > { %v990_v10 = vrot.slane %v988_v4, 1  ;;  %v5140_v13 = vsel %vm851_vm3, %v934_v32, %v1017_v6  ;;  %v800_v32 = vor.u32 %v798_v18, %v796_v3 }
 0x16a   : > { %919 = vrot.lane.b32.xlu1 %v5045_v15, %s4644_s17  ;;  %1006 = vrot.lane.b32.xlu0 %v5143_v17, %s4644_s17  ;;  %v5150_v59 = vsel %vm713_vm4, %v986_v9, %v990_v10  ;;  %v5167_v40 = vsel %vm713_vm4, %v800_v32, %v804_v33 }
 0x16e   : > { %895 = vrot.lane.b32.xlu1 %v5133_v0, %s4645_s25  ;;  %978 = vrot.lane.b32.xlu0 %v5063_v34, %s4645_s25 }
 0x170   : > { %v902_v29 = vpop.permute.xlu1 %901 }
 0x172   : > { %832 = vrot.lane.b32.xlu1 %v5143_v17, %s4646_s28  ;;  %954 = vrot.lane.b32.xlu0 %v5160_v31, %s4646_s28 }
 0x174   : > { %v878_v39 = vpop.permute.xlu1 %877 }
 0x175   : > { %v815_v41 = vpop.permute.xlu0 %814 }
 0x176   : > { %921 = vrot.lane.b32.xlu1 %v5063_v34, %s4644_s17  ;;  %1008 = vrot.lane.b32.xlu0 %v5167_v40, %s4644_s17  ;;  %v1021_v28 = vsel %vm1019_vm5, %v4849_v35, %v815_v41 }
 0x177   : > { %v1046_v21 = vsel %vm1044_vm6, %v1021_v28, %v878_v39 }
 0x178   : > { %v961_v46 = vpop.permute.xlu1 %960 }
 0x17a   : > { %897 = vrot.lane.b32.xlu1 %v5160_v31, %s4645_s25  ;;  %980 = vrot.lane.b32.xlu0 %v5081_v55, %s4645_s25 }
 0x17b   : > { %v937_v50 = vpop.permute.xlu0 %936 }
 0x17c   : > { %v904_v51 = vpop.permute.xlu1 %903  ;;  %v1108_v4 = vsel %vm1019_vm5, %v4924_v38, %v937_v50  ;;  %v1071_v38 = vsel %vm1069_vm7, %v1046_v21, %v902_v29 }
 0x17d   : > { %v1143_v10 = vsel %vm1044_vm6, %v1108_v4, %v961_v46 }
 0x17e   : > { %834 = vrot.lane.b32.xlu1 %v5167_v40, %s4646_s28  ;;  %956 = vrot.lane.b32.xlu0 %v5179_v52, %s4646_s28 }
 0x180   : > { %v880_v61 = vpop.permute.xlu1 %879  ;;  %v963_v62 = vpop.permute.xlu0 %962 }
 0x182   : > { %836 = vrot.lane.b32.xlu1 %v5187_v63, %s4646_s28  ;;  %1010 = vrot.lane.b32.xlu0 %v5187_v63, %s4644_s17 }
 0x184   : > { %v817_v2 = vpop.permute.xlu1 %816  ;;  %v939_v3 = vpop.permute.xlu0 %938 }
 0x185   : > { %v1023_v32 = vsel %vm1019_vm5, %v4866_v49, %v817_v2 }
 0x186   : > { %899 = vrot.lane.b32.xlu1 %v5179_v52, %s4645_s25  ;;  %958 = vrot.lane.b32.xlu0 %v5119_v48, %s4646_s28  ;;  %v1048_v29 = vsel %vm1044_vm6, %v1023_v32, %v880_v61  ;;  %s4584_s28 = scalar_lea.vmem %s4583_s27, 32 }
 0x187   : > { %v1074_v49 = vsel %vm1069_vm7, %v1048_v29, %v904_v51 }
 0x188   : > { %v906_v6 = vpop.permute.xlu1 %905  ;;  %v993_v9 = vpop.permute.xlu0 %992 }
 0x189   : > { %v1167_v35 = vsel %vm1069_vm7, %v1143_v10, %v993_v9 }
 0x18a   : > { %1421 = vmatprep.mubr.bf16.mxu1 %v1167_v35  ;;  %923 = vrot.lane.b32.xlu1 %v5081_v55, %s4644_s17  ;;  %v1111_v55 = vsel %vm1019_vm5, %v4934_v45, %v939_v3 }
 0x18b   : > { %1012 = vrot.lane.b32.xlu0 %v5129_v22, %s4644_s17  ;;  %1422 = vmatmul.mubr.bf16.vlgmr.msra.gmra.mrb[0].mxu1 %v1071_v38  ;;  %v1145_v46 = vsel %vm1044_vm6, %v1111_v55, %v963_v62 }
 0x18c   : > { %v882_v18 = vpop.permute.xlu1 %881  ;;  %v965_v27 = vpop.permute.xlu0 %964  ;;  %4250 = vmatpush3.bf16.msra.mxu1 %v4998_v30 }
 0x18d   : > { %4251 = vmatprep.subr.bf16.mxu1 %v4421_v14 }
 0x18f   : > { %982 = vrot.lane.b32.xlu0 %v5101_v20, %s4645_s25 }
 0x190   : > { %v819_v33 = vpop.permute.xlu1 %818  ;;  %v941_v39 = vpop.permute.xlu0 %940  ;;  %4252 = vmatpush3.bf16.msra.mxu1 %v4421_v14 }
 0x191   : > { %v1025_v45 = vsel %vm1019_vm5, %v4892_v8, %v819_v33 }
 0x192   : > { %v1050_v61 = vsel %vm1044_vm6, %v1025_v45, %v882_v18 }
 0x193   : > { %1014 = vrot.lane.b32.xlu0 %v5150_v59, %s4644_s17  ;;  %v1114_v59 = vsel %vm1019_vm5, %v4961_v5, %v941_v39  ;;  %v1077_v51 = vsel %vm1069_vm7, %v1050_v61, %v906_v6 }
 0x194   : > { %v908_v41 = vpop.permute.xlu1 %907  ;;  %v995_v30 = vpop.permute.xlu0 %994  ;;  %v1147_v3 = vsel %vm1044_vm6, %v1114_v59, %v965_v27 }
 0x195   : > { %v1170_v20 = vsel %vm1069_vm7, %v1145_v46, %v995_v30 }
 0x196   : > { %1429 = vmatprep.mubr.bf16.mxu1 %v1170_v20 }
 0x197   : > { %1430 = vmatmul.mubr.bf16.gmra.mrb[4].mxu1 %v1074_v49 }
 0x198   : > { %v884_v47 = vpop.permute.xlu1 %883  ;;  %v967_v50 = vpop.permute.xlu0 %966 }
 0x19c   : > { %v821_v54 = vpop.permute.xlu1 %820  ;;  %v943_v28 = vpop.permute.xlu0 %942 }
 0x19d   : > { %v1027_v8 = vsel %vm1019_vm5, %v4910_v23, %v821_v54  ;;  %v1117_v5 = vsel %vm1019_vm5, %v4988_v26, %v943_v28 }
 0x19e   : > { %v1052_v14 = vsel %vm1044_vm6, %v1027_v8, %v884_v47  ;;  %v1149_v27 = vsel %vm1044_vm6, %v1117_v5, %v967_v50 }
 0x19f   : > { %v1080_v6 = vsel %vm1069_vm7, %v1052_v14, %v908_v41 }
 0x1a0   : > { %v910_v2 = vpop.permute.xlu1 %909  ;;  %v997_v62 = vpop.permute.xlu0 %996 }
 0x1a1   : > { %v1173_v4 = vsel %vm1069_vm7, %v1147_v3, %v997_v62 }
 0x1a2   : > { %1437 = vmatprep.mubr.bf16.mxu1 %v1173_v4 }
 0x1a3   : > { %1438 = vmatmul.mubr.bf16.gmra.mrb[8].mxu1 %v1077_v51 }
 0x1a4   : > { %v886_v21 = vpop.permute.xlu1 %885  ;;  %v969_v9 = vpop.permute.xlu0 %968 }
 0x1a8   : > { %v823_v10 = vpop.permute.xlu1 %822  ;;  %v945_v35 = vpop.permute.xlu0 %944 }
 0x1a9   : > { %v1029_v23 = vsel %vm1019_vm5, %v4931_v43, %v823_v10  ;;  %v1120_v26 = vsel %vm1019_vm5, %v5021_v57, %v945_v35 }
 0x1aa   : > { %v1054_v30 = vsel %vm1044_vm6, %v1029_v23, %v886_v21  ;;  %v1151_v49 = vsel %vm1044_vm6, %v1120_v26, %v969_v9 }
 0x1ab   : > { %v1083_v41 = vsel %vm1069_vm7, %v1054_v30, %v910_v2 }
 0x1ac   : > { %v912_v38 = vpop.permute.xlu1 %911  ;;  %v999_v18 = vpop.permute.xlu0 %998 }
 0x1ad   : > { %v1176_v32 = vsel %vm1069_vm7, %v1149_v27, %v999_v18 }
 0x1ae   : > { %1445 = vmatprep.mubr.bf16.mxu1 %v1176_v32 }
 0x1af   : > { %1446 = vmatmul.mubr.bf16.gmra.mrb[12].mxu1 %v1080_v6 }
 0x1b0   : > { %v888_v33 = vpop.permute.xlu1 %887  ;;  %v971_v39 = vpop.permute.xlu0 %970 }
 0x1b4   : > { %v825_v55 = vpop.permute.xlu1 %824  ;;  %v947_v29 = vpop.permute.xlu0 %946 }
 0x1b5   : > { %v1031_v43 = vsel %vm1019_vm5, %v4948_v56, %v825_v55  ;;  %v1123_v57 = vsel %vm1019_vm5, %v5048_v16, %v947_v29 }
 0x1b6   : > { %v1056_v59 = vsel %vm1044_vm6, %v1031_v43, %v888_v33  ;;  %v1153_v3 = vsel %vm1044_vm6, %v1123_v57, %v971_v39 }
 0x1b7   : > { %v1086_v2 = vsel %vm1069_vm7, %v1056_v59, %v912_v38 }
 0x1b8   : > { %v914_v46 = vpop.permute.xlu1 %913  ;;  %v1001_v20 = vpop.permute.xlu0 %1000 }
 0x1b9   : > { %v1179_v47 = vsel %vm1069_vm7, %v1151_v49, %v1001_v20 }
 0x1ba   : > { %1453 = vmatprep.mubr.bf16.mxu1 %v1179_v47 }
 0x1bb   : > { %1454 = vmatmul.mubr.bf16.gmra.mrb[16].mxu1 %v1083_v41 }
 0x1bc   : > { %v890_v50 = vpop.permute.xlu1 %889  ;;  %v973_v45 = vpop.permute.xlu0 %972 }
 0x1c0   : > { %v827_v54 = vpop.permute.xlu1 %826  ;;  %v949_v28 = vpop.permute.xlu0 %948 }
 0x1c1   : > { %v1033_v56 = vsel %vm1019_vm5, %v4967_v7, %v827_v54  ;;  %v1126_v16 = vsel %vm1019_vm5, %v5075_v53, %v949_v28 }
 0x1c2   : > { %v1058_v10 = vsel %vm1044_vm6, %v1033_v56, %v890_v50  ;;  %v1155_v14 = vsel %vm1044_vm6, %v1126_v16, %v973_v45 }
 0x1c3   : > { %v1089_v38 = vsel %vm1069_vm7, %v1058_v10, %v914_v46 }
 0x1c4   : > { %v916_v61 = vpop.permute.xlu1 %915  ;;  %v1003_v62 = vpop.permute.xlu0 %1002 }
 0x1c5   : > { %v1182_v4 = vsel %vm1069_vm7, %v1153_v3, %v1003_v62 }
 0x1c6   : > { %1461 = vmatprep.mubr.bf16.mxu1 %v1182_v4 }
 0x1c7   : > { %1462 = vmatmul.mubr.bf16.gmra.mrb[20].mxu1 %v1086_v2 }
 0x1c8   : > { %v892_v51 = vpop.permute.xlu1 %891  ;;  %v975_v21 = vpop.permute.xlu0 %974 }
 0x1cc   : > { %v829_v9 = vpop.permute.xlu1 %828  ;;  %v951_v8 = vpop.permute.xlu0 %950 }
 0x1cd   : > { %v1035_v7 = vsel %vm1019_vm5, %v4985_v25, %v829_v9  ;;  %v1129_v53 = vsel %vm1019_vm5, %v5106_v24, %v951_v8 }
 0x1ce   : > { %v1060_v39 = vsel %vm1044_vm6, %v1035_v7, %v892_v51  ;;  %v1157_v29 = vsel %vm1044_vm6, %v1129_v53, %v975_v21 }
 0x1cf   : > { %v1092_v30 = vsel %vm1069_vm7, %v1060_v39, %v916_v61 }
 0x1d0   : > { %v918_v35 = vpop.permute.xlu1 %917  ;;  %v1005_v5 = vpop.permute.xlu0 %1004 }
 0x1d1   : > { %v1185_v18 = vsel %vm1069_vm7, %v1155_v14, %v1005_v5 }
 0x1d2   : > { %1469 = vmatprep.mubr.bf16.mxu1 %v1185_v18 }
 0x1d3   : > { %1470 = vmatmul.mubr.bf16.gmra.mrb[24].mxu1 %v1089_v38 }
 0x1d4   : > { %v894_v27 = vpop.permute.xlu1 %893  ;;  %v977_v32 = vpop.permute.xlu0 %976 }
 0x1d8   : > { %v831_v6 = vpop.permute.xlu1 %830  ;;  %v953_v33 = vpop.permute.xlu0 %952 }
 0x1d9   : > { %v1037_v25 = vsel %vm1019_vm5, %v5009_v42, %v831_v6  ;;  %v1132_v24 = vsel %vm1019_vm5, %v5143_v17, %v953_v33 }
 0x1da   : > { %v1062_v41 = vsel %vm1044_vm6, %v1037_v25, %v894_v27  ;;  %v1159_v43 = vsel %vm1044_vm6, %v1132_v24, %v977_v32  ;;  %v4424_v24 = vld [vmem:[%s6115_s5 + $0x48] sm:$0xff]  }
 0x1db   : > { %v1095_v28 = vsel %vm1069_vm7, %v1062_v41, %v918_v35 }
 0x1dc   : > { %v920_v23 = vpop.permute.xlu1 %919  ;;  %v1007_v55 = vpop.permute.xlu0 %1006 }
 0x1dd   : > { %v1188_v26 = vsel %vm1069_vm7, %v1157_v29, %v1007_v55  ;;  %v4422_v29 = vld [vmem:[%s6115_s5 + $0x40] sm:$0xff]  }
 0x1de   : > { %1477 = vmatprep.mubr.bf16.mxu1 %v1188_v26  ;;  %v4423_v26 = vld [vmem:[%s6115_s5] sm:$0xff]   ;;  %3976 = vmatprep.subr.bf16.mxu0 %v4422_v29 }
 0x1df   : > { %1478 = vmatmul.mubr.bf16.gmra.mrb[28].mxu1 %v1092_v30  ;;  %3977 = vmatpush3.bf16.msra.mxu0 %v4423_v26 }
 0x1e0   : > { %v896_v46 = vpop.permute.xlu1 %895  ;;  %v979_v20 = vpop.permute.xlu0 %978  ;;  %3978 = vmatprep.subr.bf16.mxu0 %v4424_v24 }
 0x1e4   : > { %v833_v49 = vpop.permute.xlu1 %832  ;;  %v955_v47 = vpop.permute.xlu0 %954 }
 0x1e5   : > { %v1039_v42 = vsel %vm1019_vm5, %v5027_v60, %v833_v49  ;;  %v1135_v17 = vsel %vm1019_vm5, %v5167_v40, %v955_v47 }
 0x1e6   : > { %v1064_v3 = vsel %vm1044_vm6, %v1039_v42, %v896_v46  ;;  %v1161_v2 = vsel %vm1044_vm6, %v1135_v17, %v979_v20  ;;  %v4427_v42 = vld [vmem:[%s6115_s5 + $0x10] sm:$0xff]  }
 0x1e7   : > { %v1098_v21 = vsel %vm1069_vm7, %v1064_v3, %v920_v23 }
 0x1e8   : > { %v922_v50 = vpop.permute.xlu1 %921  ;;  %v1009_v45 = vpop.permute.xlu0 %1008 }
 0x1e9   : > { %v1191_v54 = vsel %vm1069_vm7, %v1159_v43, %v1009_v45 }
 0x1ea   : > { %1485 = vmatprep.mubr.bf16.mxu1 %v1191_v54 }
 0x1eb   : > { %1486 = vmatmul.mubr.bf16.gmra.mrb[32].mxu1 %v1095_v28 }
 0x1ec   : > { %v898_v57 = vpop.permute.xlu1 %897  ;;  %v981_v59 = vpop.permute.xlu0 %980 }
 0x1f0   : > { %v957_v61 = vpop.permute.xlu0 %956  ;;  %v835_v62 = vpop.permute.xlu1 %834 }
 0x1f1   : > { %v1041_v60 = vsel %vm1019_vm5, %v5045_v15, %v835_v62  ;;  %v1138_v40 = vsel %vm1019_vm5, %v5187_v63, %v957_v61 }
 0x1f2   : > { %v1066_v8 = vsel %vm1044_vm6, %v1041_v60, %v898_v57  ;;  %v1163_v10 = vsel %vm1044_vm6, %v1138_v40, %v981_v59  ;;  %v4426_v59 = vld [vmem:[%s6115_s5 + $0x50] sm:$0xff]   ;;  %v4431_v60 = vld [vmem:[%s6115_s5 + $0x20] sm:$0xff]  }
 0x1f3   : > { %v1101_v14 = vsel %vm1069_vm7, %v1066_v8, %v922_v50  ;;  %v4425_v50 = vld [vmem:[%s6115_s5 + $0x8] sm:$0xff]   ;;  %v4437_v40 = vld [vmem:[%s6115_s5 + $0x100] sm:$0xff]  }
 0x1f4   : > { %v1011_v4 = vpop.permute.xlu0 %1010  ;;  %v837_v56 = vpop.permute.xlu1 %836  ;;  %3979 = vmatpush3.bf16.msra.mxu0 %v4425_v50  ;;  %v4432_v8 = vld [vmem:[%s6115_s5 + $0x68] sm:$0xff]  }
 0x1f5   : > { %v1194_v51 = vsel %vm1069_vm7, %v1161_v2, %v1011_v4  ;;  %v1043_v63 = vsel %vm1019_vm5, %v5063_v34, %v837_v56  ;;  %3980 = vmatprep.subr.bf16.mxu0 %v4426_v59  ;;  %v4428_v4 = vld [vmem:[%s6115_s5 + $0x58] sm:$0xff]  }
 0x1f6   : > { %1493 = vmatprep.mubr.bf16.mxu1 %v1194_v51  ;;  %v4429_v2 = vld [vmem:[%s6115_s5 + $0x18] sm:$0xff]   ;;  %v4430_v51 = vld [vmem:[%s6115_s5 + $0x60] sm:$0xff]  }
 0x1f7   : > { %1494 = vmatmul.mubr.bf16.gmra.mrb[36].mxu1 %v1098_v21 }
 0x1f8   : > { %v959_v9 = vpop.permute.xlu0 %958  ;;  %v900_v35 = vpop.permute.xlu1 %899  ;;  %3981 = vmatpush3.bf16.msra.mxu0 %v4427_v42 }
 0x1f9   : > { %v1141_v38 = vsel %vm1019_vm5, %v5129_v22, %v959_v9  ;;  %v1068_v7 = vsel %vm1044_vm6, %v1043_v63, %v900_v35  ;;  %3982 = vmatprep.subr.bf16.mxu0 %v4428_v4  ;;  %v4436_v9 = vld [vmem:[%s6115_s5 + $0x140] sm:$0xff]   ;;  %v4442_v35 = vld [vmem:[%s6115_s5 + $0x150] sm:$0xff]  }
 0x1fa   : > { %4020 = vmatprep.subr.bf16.mxu1 %v4436_v9  ;;  %v4435_v63 = vld [vmem:[%s6115_s5 + $0x30] sm:$0xff]  }
 0x1fc   : > { %v924_v15 = vpop.permute.xlu1 %923  ;;  %3983 = vmatpush3.bf16.msra.mxu0 %v4429_v2 }
 0x1fd   : > { %v1013_v16 = vpop.permute.xlu0 %1012  ;;  %v1104_v33 = vsel %vm1069_vm7, %v1068_v7, %v924_v15  ;;  %3984 = vmatprep.subr.bf16.mxu0 %v4430_v51  ;;  %v4438_v7 = vld [vmem:[%s6115_s5 + $0x78] sm:$0xff]   ;;  %v5446_v51 = vld [vmem:[%s6114_s4] ss:$0 sm:$0xff] }
 0x1fe   : > { %v1197_v5 = vsel %vm1069_vm7, %v1163_v10, %v1013_v16  ;;  %v4440_v16 = vld [vmem:[%s6115_s5 + $0x148] sm:$0xff]  }
 0x1ff   : > { %1501 = vmatprep.mubr.bf16.mxu1 %v1197_v5  ;;  %v4441_v10 = vld [vmem:[%s6115_s5 + $0x108] sm:$0xff]  }
 0x200   : > { %1502 = vmatmul.mubr.bf16.gmra.mrb[40].mxu1 %v1101_v14  ;;  %3985 = vmatpush3.bf16.msra.mxu0 %v4431_v60  ;;  %v4433_v5 = vld [vmem:[%s6115_s5 + $0x28] sm:$0xff]   ;;  %v4434_v14 = vld [vmem:[%s6115_s5 + $0x70] sm:$0xff]  }
 0x201   : > { %v983_v18 = vpop.permute.xlu0 %982  ;;  %3986 = vmatprep.subr.bf16.mxu0 %v4432_v8 }
 0x202   : > { %v1165_v27 = vsel %vm1044_vm6, %v1141_v38, %v983_v18  ;;  %v4443_v18 = vld [vmem:[%s6115_s5 + $0x110] sm:$0xff]  }
 0x204   : > { %3987 = vmatpush3.bf16.msra.mxu0 %v4433_v5 }
 0x205   : > { %v1015_v32 = vpop.permute.xlu0 %1014  ;;  %3988 = vmatprep.subr.bf16.mxu0 %v4434_v14 }
 0x206   : > { %v1200_v6 = vsel %vm1069_vm7, %v1165_v27, %v1015_v32 }
 0x207   : > { %1509 = vmatprep.mubr.bf16.mxu1 %v1200_v6 }
 0x208   : > { %1510 = vmatmul.mubr.bf16.gmra.mrb[44].mxu1 %v1104_v33  ;;  %3989 = vmatpush3.bf16.msra.mxu0 %v4435_v63 }
 0x209   : > { %4253 = vmatprep.mubr.msk.bf16.mxu1 %vm1019_vm5, %v4921_v37  ;;  %3990 = vmatprep.subr.bf16.mxu0 %v4438_v7 }
 0x210   : > { %4254 = vmatmul.mubr.msk.bf16.vlgmr.msra.gmra.mrb[48].mxu1 %vm1019_vm5, %v4951_v58 }
 0x211   : > { %4257 = vmatprep.mubr.msk.bf16.mxu1 %vm1019_vm5, %v4979_v19  ;;  %4021 = vmatpush3.bf16.msra.mxu1 %v4437_v40 }
 0x212   : > { %4022 = vmatprep.subr.bf16.mxu1 %v4440_v16 }
 0x215   : > { %4023 = vmatpush3.bf16.msra.mxu1 %v4441_v10 }
 0x216   : > { %4024 = vmatprep.subr.bf16.mxu1 %v4442_v35 }
 0x218   : > { %4258 = vmatmul.mubr.msk.bf16.gmra.mrb[52].mxu1 %vm1019_vm5, %v5012_v44 }
 0x219   : > { %4261 = vmatprep.mubr.msk.bf16.mxu1 %vm1019_vm5, %v5039_v11  ;;  %4025 = vmatpush3.bf16.msra.mxu1 %v4443_v18 }
 0x220   : > { %4262 = vmatmul.mubr.msk.bf16.gmra.mrb[56].mxu1 %vm1019_vm5, %v5066_v36 }
 0x221   : > { %4265 = vmatprep.mubr.msk.bf16.mxu1 %vm1019_vm5, %v5094_v12 }
 0x228   : > { %4266 = vmatmul.mubr.msk.bf16.gmra.mrb[60].mxu1 %vm1019_vm5, %v5133_v0 }
 0x229   : > { %4269 = vmatprep.mubr.msk.bf16.mxu1 %vm1019_vm5, %v5160_v31 }
 0x230   : > { %4270 = vmatmul.mubr.msk.bf16.gmra.mrb[64].mxu1 %vm1019_vm5, %v5179_v52 }
 0x231   : > { %4273 = vmatprep.mubr.msk.bf16.mxu1 %vm1019_vm5, %v5119_v48 }
 0x238   : > { %4274 = vmatmul.mubr.msk.bf16.gmra.mrb[68].mxu1 %vm1019_vm5, %v5140_v13 }
 0x25e   : > { %v3890_v37 = vpop.f32.mrb[0].mxu1 }
 0x25f   : > { %v3891_v58 = vpop.f32.mrb[1].mxu1 }
 0x260   : > { %v5329_v19 = vadd.f32 %v3891_v58, %v3890_v37  ;;  %v3893_v44 = vpop.f32.mrb[2].mxu1  ;;  %v4439_v37 = vld [vmem:[%s6115_s5 + $0x38] sm:$0xff]  }
 0x261   : > { %v3894_v11 = vpop.f32.mrb[3].mxu1  ;;  %3991 = vmatpush3.bf16.msra.mxu0 %v4439_v37 }
 0x262   : > { %v5331_v34 = vadd.f32 %v3894_v11, %v3893_v44  ;;  %v1424_v60 = vadd.f32 %v5329_v19, %v5446_v51  ;;  %v4445_v19 = vld [vmem:[%s6115_s5 + $0x118] sm:$0xff]  }
 0x264   : > { %v1427_v5 = vadd.f32 %v5331_v34, %v5446_v51 }
 0x26a   : > { %v3896_v36 = vpop.f32.mrb[4].mxu1 }
 0x26b   : > { %v3897_v12 = vpop.f32.mrb[5].mxu1 }
 0x26c   : > { %v5333_v22 = vadd.f32 %v3897_v12, %v3896_v36  ;;  %v3899_v0 = vpop.f32.mrb[6].mxu1 }
 0x26d   : > { %v3900_v31 = vpop.f32.mrb[7].mxu1 }
 0x26e   : > { %v5335_v52 = vadd.f32 %v3900_v31, %v3899_v0 }
 0x270   : > { %v1435_v16 = vadd.f32 %v5335_v52, %v5446_v51 }
 0x276   : > { %v3902_v48 = vpop.f32.mrb[8].mxu1 }
 0x277   : > { %v3903_v53 = vpop.f32.mrb[9].mxu1 }
 0x278   : > { %v5337_v39 = vadd.f32 %v3903_v53, %v3902_v48  ;;  %v3905_v13 = vpop.f32.mrb[10].mxu1 }
 0x279   : > { %v3906_v23 = vpop.f32.mrb[11].mxu1 }
 0x27a   : > { %v5339_v55 = vadd.f32 %v3906_v23, %v3905_v13 }
 0x282   : > { %v3908_v30 = vpop.f32.mrb[12].mxu1 }
 0x283   : > { %v3909_v46 = vpop.f32.mrb[13].mxu1 }
 0x284   : > { %v5347_v20 = vadd.f32 %v3909_v46, %v3908_v30  ;;  %v3911_v25 = vpop.f32.mrb[14].mxu1 }
 0x285   : > { %v3912_v49 = vpop.f32.mrb[15].mxu1 }
 0x286   : > { %v5349_v47 = vadd.f32 %v3912_v49, %v3911_v25  ;;  %v1448_v7 = vadd.f32 %v5347_v20, %v5446_v51 }
 0x28e   : > { %v3914_v41 = vpop.f32.mrb[16].mxu1 }
 0x28f   : > { %v3915_v45 = vpop.f32.mrb[17].mxu1 }
 0x290   : > { %v5357_v43 = vadd.f32 %v3915_v45, %v3914_v41  ;;  %v3917_v54 = vpop.f32.mrb[18].mxu1 }
 0x291   : > { %v3918_v28 = vpop.f32.mrb[19].mxu1 }
 0x292   : > { %v5359_v57 = vadd.f32 %v3918_v28, %v3917_v54 }
 0x29a   : > { %v3920_v61 = vpop.f32.mrb[20].mxu1 }
 0x29b   : > { %v3921_v17 = vpop.f32.mrb[21].mxu1 }
 0x29c   : > { %v5367_v62 = vadd.f32 %v3921_v17, %v3920_v61  ;;  %v3923_v3 = vpop.f32.mrb[22].mxu1 }
 0x29d   : > { %v3924_v21 = vpop.f32.mrb[23].mxu1 }
 0x29e   : > { %v5378_v56 = vadd.f32 %v3924_v21, %v3923_v3  ;;  %v1432_v21 = vadd.f32 %v5333_v22, %v5446_v51  ;;  %v4444_v22 = vld [vmem:[%s6115_s5 + $0x158] sm:$0xff]  }
 0x29f   : > { %4026 = vmatprep.subr.bf16.mxu1 %v4444_v22 }
 0x2a0   : > { %4027 = vmatpush3.bf16.msra.mxu1 %v4445_v19  ;;  %v1467_v19 = vadd.f32 %v5378_v56, %v5446_v51  ;;  %v1459_v56 = vadd.f32 %v5359_v57, %v5446_v51 }
 0x2a6   : > { %v3926_v38 = vpop.f32.mrb[24].mxu1 }
 0x2a7   : > { %v3927_v15 = vpop.f32.mrb[25].mxu1 }
 0x2a8   : > { %v5413_v27 = vadd.f32 %v3927_v15, %v3926_v38  ;;  %v3929_v32 = vpop.f32.mrb[26].mxu1 }
 0x2a9   : > { %v3930_v6 = vpop.f32.mrb[27].mxu1 }
 0x2aa   : > { %v5418_v33 = vadd.f32 %v3930_v6, %v3929_v32  ;;  %v4446_v6 = vld [vmem:[%s6115_s5 + $0x160] sm:$0xff]  }
 0x2ab   : > { %4028 = vmatprep.subr.bf16.mxu1 %v4446_v6 }
 0x2b2   : > { %v3932_v58 = vpop.f32.mrb[28].mxu1 }
 0x2b3   : > { %v3933_v44 = vpop.f32.mrb[29].mxu1 }
 0x2b4   : > { %v5423_v11 = vadd.f32 %v3933_v44, %v3932_v58  ;;  %v3935_v36 = vpop.f32.mrb[30].mxu1 }
 0x2b5   : > { %v3936_v12 = vpop.f32.mrb[31].mxu1 }
 0x2b6   : > { %v5425_v0 = vadd.f32 %v3936_v12, %v3935_v36  ;;  %v1440_v12 = vadd.f32 %v5337_v39, %v5446_v51  ;;  %v1443_v39 = vadd.f32 %v5339_v55, %v5446_v51 }
 0x2be   : > { %v3938_v31 = vpop.f32.mrb[32].mxu1 }
 0x2bf   : > { %v3939_v48 = vpop.f32.mrb[33].mxu1 }
 0x2c0   : > { %v5427_v53 = vadd.f32 %v3939_v48, %v3938_v31  ;;  %v3941_v13 = vpop.f32.mrb[34].mxu1  ;;  %v4447_v31 = vld [vmem:[%s6115_s5 + $0x120] sm:$0xff]  }
 0x2c1   : > { %v3942_v23 = vpop.f32.mrb[35].mxu1  ;;  %4029 = vmatpush3.bf16.msra.mxu1 %v4447_v31 }
 0x2c2   : > { %v5429_v29 = vadd.f32 %v3942_v23, %v3941_v13 }
 0x2ca   : > { %v3944_v26 = vpop.f32.mrb[36].mxu1 }
 0x2cb   : > { %v3945_v30 = vpop.f32.mrb[37].mxu1 }
 0x2cc   : > { %v5431_v46 = vadd.f32 %v3945_v30, %v3944_v26  ;;  %v3947_v25 = vpop.f32.mrb[38].mxu1  ;;  %v1451_v26 = vadd.f32 %v5349_v47, %v5446_v51  ;;  %v4448_v30 = vld [vmem:[%s6115_s5 + $0xc0] sm:$0xff]   ;;  %v4450_v47 = vld [vmem:[%s6115_s5 + $0x168] sm:$0xff]  }
 0x2cd   : > { %v3948_v49 = vpop.f32.mrb[39].mxu1  ;;  %3998 = vmatprep.subr.bf16.mxu0 %v4448_v30  ;;  %4030 = vmatprep.subr.bf16.mxu1 %v4450_v47  ;;  %v1472_v30 = vadd.f32 %v5413_v27, %v5446_v51  ;;  %v4462_v27 = vld [vmem:[%s6115_s5 + $0x240] sm:$0xff]  }
 0x2ce   : > { %v5433_v24 = vadd.f32 %v3948_v49, %v3947_v25 }
 0x2d3   : > { %v3950_v41 = vpop.f32.mrb[40].mxu1 }
 0x2d4   : > { %v3951_v50 = vpop.f32.mrb[41].mxu1 }
 0x2d5   : > { %v5435_v45 = vadd.f32 %v3951_v50, %v3950_v41  ;;  %v3953_v54 = vpop.f32.mrb[42].mxu1 }
 0x2d6   : > { %v3954_v28 = vpop.f32.mrb[43].mxu1 }
 0x2d7   : > { %v5437_v59 = vadd.f32 %v3954_v28, %v3953_v54 }
 0x2db   : > { %v3956_v42 = vpop.f32.mrb[44].mxu1 }
 0x2dc   : > { %v3957_v61 = vpop.f32.mrb[45].mxu1 }
 0x2dd   : > { %v5439_v17 = vadd.f32 %v3957_v61, %v3956_v42  ;;  %v3959_v3 = vpop.f32.mrb[46].mxu1 }
 0x2de   : > { %v3960_v4 = vpop.f32.mrb[47].mxu1 }
 0x2df   : > { %v5441_v2 = vadd.f32 %v3960_v4, %v3959_v3 }
 0x2e3   : > { %v4255_v9 = vpop.f32.mrb[48].mxu1 }
 0x2e4   : > { %v1561_v40 = vadd.f32 %v4255_v9, %v1432_v21  ;;  %v1552_v8 = vpop.f32.mrb[49].mxu1  ;;  %v4451_v21 = vld [vmem:[%s6115_s5 + $0x128] sm:$0xff]  }
 0x2e5   : > { %v1553_v10 = vadd.f32 %v1552_v8, %v1424_v60  ;;  %v4256_v35 = vpop.f32.mrb[50].mxu1  ;;  %4031 = vmatpush3.bf16.msra.mxu1 %v4451_v21 }
 0x2e6   : > { %v5456_v14 = vadd.f32 %v4256_v35, %v1435_v16  ;;  %v1555_v18 = vpop.f32.mrb[51].mxu1  ;;  %v1675_v15 = vrot.slane %v1561_v40, 1 }
 0x2e7   : > { %v1556_v38 = vadd.f32 %v1555_v18, %v1427_v5  ;;  %v1672_v63 = vrot.slane %v1553_v10, 1 }
 0x2e8   : > { %v1677_v52 = vrot.slane %v5456_v14, 1 }
 0x2e9   : > { %v1673_v32 = vrot.slane %v1556_v38, 1 }
 0x2ea   : > { %v1678_v34 = vsel %vm851_vm3, %v1675_v15, %v1677_v52 }
 0x2eb   : > { %v1745_v37 = vmax.f32 %v1561_v40, %v1678_v34  ;;  %v1674_v58 = vsel %vm851_vm3, %v1672_v63, %v1673_v32  ;;  %v1676_v44 = vsel %vm851_vm3, %v1673_v32, %v1675_v15  ;;  %v4259_v36 = vpop.f32.mrb[52].mxu1  ;;  %v1456_v40 = vadd.f32 %v5357_v43, %v5446_v51  ;;  %v4454_v43 = vld [vmem:[%s6115_s5 + $0x170] sm:$0xff]  }
 0x2ec   : > { %v1743_v48 = vmax.f32 %v1553_v10, %v1674_v58  ;;  %v1744_v13 = vmax.f32 %v1556_v38, %v1676_v44  ;;  %v1577_v20 = vadd.f32 %v4259_v36, %v1448_v7  ;;  %v1568_v23 = vpop.f32.mrb[53].mxu1  ;;  %v1464_v10 = vadd.f32 %v5367_v62, %v5446_v51  ;;  %v4455_v32 = vld [vmem:[%s6115_s5 + $0x130] sm:$0xff]   ;;  %4032 = vmatprep.subr.bf16.mxu1 %v4454_v43 }
 0x2ed   : > { %v1569_v25 = vadd.f32 %v1568_v23, %v1440_v12  ;;  %v4260_v49 = vpop.f32.mrb[54].mxu1  ;;  %4033 = vmatpush3.bf16.msra.mxu1 %v4455_v32  ;;  %v4458_v12 = vld [vmem:[%s6115_s5 + $0x178] sm:$0xff]  }
 0x2ee   : > { %v5485_v41 = vmax.f32 %v1743_v48, %v1745_v37  ;;  %v5487_v50 = vadd.f32 %v4260_v49, %v1451_v26  ;;  %v1571_v54 = vpop.f32.mrb[55].mxu1  ;;  %v1683_v61 = vrot.slane %v1577_v20, 1  ;;  %4034 = vmatprep.subr.bf16.mxu1 %v4458_v12  ;;  %v1499_v12 = vadd.f32 %v5433_v24, %v5446_v51 }
 0x2ef   : > { %v1679_v28 = vrot.slane %v1569_v25, 1  ;;  %v5489_v42 = vadd.f32 %v1571_v54, %v1443_v39  ;;  %v1480_v39 = vadd.f32 %v5423_v11, %v5446_v51 }
 0x2f0   : > { %v1685_v3 = vrot.slane %v5487_v50, 1  ;;  %v1780_v4 = vrot.slane %v5485_v41, 2  ;;  %v1786_v55 = vrot.slane %v5485_v41, 6 }
 0x2f1   : > { %v1680_v9 = vsel %vm851_vm3, %v1677_v52, %v1679_v28  ;;  %v1681_v60 = vrot.slane %v5489_v42, 1 }
 0x2f2   : > { %v1746_v8 = vmax.f32 %v5456_v14, %v1680_v9  ;;  %v1686_v16 = vsel %vm851_vm3, %v1683_v61, %v1685_v3  ;;  %v4341_v35 = vpack.i.bf16 %v1780_v4, %v1786_v55 }
 0x2f3   : > { %v1749_v5 = vmax.f32 %v1577_v20, %v1686_v16  ;;  %v1682_v18 = vsel %vm851_vm3, %v1679_v28, %v1681_v60  ;;  %v1684_v22 = vsel %vm851_vm3, %v1681_v60, %v1683_v61  ;;  %v4263_v38 = vpop.f32.mrb[56].mxu1  ;;  %v4459_v20 = vld [vmem:[%s6115_s5 + $0x138] sm:$0xff]  }
 0x2f4   : > { %v1747_v14 = vmax.f32 %v1569_v25, %v1682_v18  ;;  %v1748_v15 = vmax.f32 %v5489_v42, %v1684_v22  ;;  %v1593_v52 = vadd.f32 %v4263_v38, %v1464_v10  ;;  %v1584_v62 = vpop.f32.mrb[57].mxu1  ;;  %4342 = vrot.lane.b32.xlu0 %v4341_v35, %s4645_s25  ;;  %v5517_v63 = vmax.f32 %v1744_v13, %v1746_v8 }
 0x2f5   : > { %v1585_v34 = vadd.f32 %v1584_v62, %v1456_v40  ;;  %v4264_v7 = vpop.f32.mrb[58].mxu1  ;;  %4035 = vmatpush3.bf16.msra.mxu1 %v4459_v20  ;;  %v1475_v40 = vadd.f32 %v5418_v33, %v5446_v51  ;;  %v1491_v20 = vadd.f32 %v5429_v29, %v5446_v51 }
 0x2f6   : > { %v5524_v6 = vmax.f32 %v1747_v14, %v1749_v5  ;;  %v5526_v37 = vadd.f32 %v4264_v7, %v1467_v19  ;;  %v1587_v58 = vpop.f32.mrb[59].mxu1  ;;  %v1691_v31 = vrot.slane %v1593_v52, 1  ;;  %v1791_v13 = vrot.slane %v5517_v63, 2  ;;  %4064 = vmatprep.subr.bf16.mxu1 %v4462_v27 }
 0x2f7   : > { %v1687_v44 = vrot.slane %v1585_v34, 1  ;;  %v5528_v36 = vadd.f32 %v1587_v58, %v1459_v56  ;;  %v1512_v27 = vadd.f32 %v5439_v17, %v5446_v51 }
 0x2f8   : > { %v1693_v48 = vrot.slane %v5526_v37, 1  ;;  %v1799_v57 = vrot.slane %v5524_v6, 2  ;;  %v1805_v10 = vrot.slane %v5524_v6, 6 }
 0x2f9   : > { %v1688_v23 = vsel %vm851_vm3, %v1685_v3, %v1687_v44  ;;  %v1689_v26 = vrot.slane %v5528_v36, 1  ;;  %v1483_v3 = vadd.f32 %v5425_v0, %v5446_v51 }
 0x2fa   : > { %v1750_v25 = vmax.f32 %v5487_v50, %v1688_v23  ;;  %v1694_v49 = vsel %vm851_vm3, %v1691_v31, %v1693_v48  ;;  %v4346_v54 = vpack.i.bf16 %v1791_v13, %v1799_v57 }
 0x2fb   : > { %v1753_v28 = vmax.f32 %v1593_v52, %v1694_v49  ;;  %v1690_v42 = vsel %vm851_vm3, %v1687_v44, %v1689_v26  ;;  %v1692_v47 = vsel %vm851_vm3, %v1689_v26, %v1691_v31  ;;  %v4267_v61 = vpop.f32.mrb[60].mxu1  ;;  %v1488_v52 = vadd.f32 %v5427_v53, %v5446_v51 }
 0x2fc   : > { %v1751_v50 = vmax.f32 %v1585_v34, %v1690_v42  ;;  %v1752_v4 = vmax.f32 %v5528_v36, %v1692_v47  ;;  %v1609_v55 = vadd.f32 %v4267_v61, %v1480_v39  ;;  %v1600_v11 = vpop.f32.mrb[61].mxu1  ;;  %4347 = vrot.lane.b32.xlu1 %v4346_v54, %s4645_s25  ;;  %v5556_v21 = vmax.f32 %v1748_v15, %v1750_v25 }
 0x2fd   : > { %v1601_v9 = vadd.f32 %v1600_v11, %v1472_v30  ;;  %v4268_v60 = vpop.f32.mrb[62].mxu1  ;;  %v1496_v34 = vadd.f32 %v5431_v46, %v5446_v51  ;;  %v1504_v61 = vadd.f32 %v5435_v45, %v5446_v51 }
 0x2fe   : > { %v5560_v0 = vmax.f32 %v1751_v50, %v1753_v28  ;;  %v1612_v8 = vadd.f32 %v4268_v60, %v1483_v3  ;;  %v1603_v16 = vpop.f32.mrb[63].mxu1  ;;  %v1810_v35 = vrot.slane %v5556_v21, 2  ;;  %v1699_v5 = vrot.slane %v1609_v55, 1 }
 0x2ff   : > { %v1695_v18 = vrot.slane %v1601_v9, 1  ;;  %v1604_v22 = vadd.f32 %v1603_v16, %v1475_v40  ;;  %v1515_v60 = vadd.f32 %v5441_v2, %v5446_v51 }
 0x300   : > { %v1701_v38 = vrot.slane %v1612_v8, 1  ;;  %v4351_v19 = vpack.i.bf16 %v1805_v10, %v1810_v35  ;;  %v1818_v43 = vrot.slane %v5560_v0, 2  ;;  %v1824_v14 = vrot.slane %v5560_v0, 6 }
 0x301   : > { %v1696_v33 = vsel %vm851_vm3, %v1693_v48, %v1695_v18  ;;  %v1697_v15 = vrot.slane %v1604_v22, 1 }
 0x302   : > { %v1754_v62 = vmax.f32 %v5526_v37, %v1696_v33  ;;  %v1702_v32 = vsel %vm851_vm3, %v1699_v5, %v1701_v38  ;;  %4352 = vrot.lane.b32.xlu0 %v4351_v19, %s4645_s25  ;;  %v4356_v7 = vpack.i.bf16 %v1818_v43, %v1824_v14 }
 0x303   : > { %v1757_v56 = vmax.f32 %v1609_v55, %v1702_v32  ;;  %v1698_v58 = vsel %vm851_vm3, %v1695_v18, %v1697_v15  ;;  %v1700_v44 = vsel %vm851_vm3, %v1697_v15, %v1699_v5  ;;  %v4271_v36 = vpop.f32.mrb[64].mxu1  ;;  %v1507_v5 = vadd.f32 %v5437_v59, %v5446_v51 }
 0x304   : > { %v1755_v53 = vmax.f32 %v1601_v9, %v1698_v58  ;;  %v1756_v31 = vmax.f32 %v1604_v22, %v1700_v44  ;;  %v1625_v37 = vadd.f32 %v4271_v36, %v1496_v34  ;;  %v1616_v48 = vpop.f32.mrb[65].mxu1  ;;  %4357 = vrot.lane.b32.xlu1 %v4356_v7, %s4645_s25  ;;  %v5579_v13 = vmax.f32 %v1752_v4, %v1754_v62 }
 0x305   : > { %v1617_v57 = vadd.f32 %v1616_v48, %v1488_v52  ;;  %v4272_v46 = vpop.f32.mrb[66].mxu1 }
 0x306   : > { %v5583_v23 = vmax.f32 %v1755_v53, %v1757_v56  ;;  %v1628_v26 = vadd.f32 %v4272_v46, %v1499_v12  ;;  %v1619_v30 = vpop.f32.mrb[67].mxu1  ;;  %v1707_v24 = vrot.slane %v1625_v37, 1  ;;  %v1829_v54 = vrot.slane %v5579_v13, 2 }
 0x307   : > { %v1703_v25 = vrot.slane %v1617_v57, 1  ;;  %v1620_v49 = vadd.f32 %v1619_v30, %v1491_v20 }
 0x308   : > { %v1709_v39 = vrot.slane %v1628_v26, 1  ;;  %v1837_v28 = vrot.slane %v5583_v23, 2  ;;  %v1843_v19 = vrot.slane %v5583_v23, 6 }
 0x309   : > { %v1704_v42 = vsel %vm851_vm3, %v1701_v38, %v1703_v25  ;;  %v1705_v47 = vrot.slane %v1620_v49, 1 }
 0x30a   : > { %v1758_v3 = vmax.f32 %v1612_v8, %v1704_v42  ;;  %v1710_v29 = vsel %vm851_vm3, %v1707_v24, %v1709_v39  ;;  %v4361_v50 = vpack.i.bf16 %v1829_v54, %v1837_v28  ;;  %v1784_v28 = vrot.slane %v5485_v41, 4 }
 0x30b   : > { %v1761_v4 = vmax.f32 %v1625_v37, %v1710_v29  ;;  %v1706_v55 = vsel %vm851_vm3, %v1703_v25, %v1705_v47  ;;  %v1708_v11 = vsel %vm851_vm3, %v1705_v47, %v1707_v24  ;;  %v4275_v9 = vpop.f32.mrb[68].mxu1 }
 0x30c   : > { %v1759_v40 = vmax.f32 %v1617_v57, %v1706_v55  ;;  %v1760_v16 = vmax.f32 %v1620_v49, %v1708_v11  ;;  %v1641_v10 = vadd.f32 %v4275_v9, %v1512_v27  ;;  %v1632_v45 = vpop.f32.mrb[69].mxu1  ;;  %4362 = vrot.lane.b32.xlu0 %v4361_v50, %s4645_s25  ;;  %v5598_v8 = vmax.f32 %v1756_v31, %v1758_v3  ;;  %v4449_v50 = vld [vmem:[%s6115_s5 + $0x80] sm:$0xff]   ;;  %v4456_v9 = vld [vmem:[%s6115_s5 + $0xd0] sm:$0xff]  }
 0x30d   : > { %v1633_v35 = vadd.f32 %v1632_v45, %v1504_v61  ;;  %v4276_v17 = vpop.f32.mrb[70].mxu1  ;;  %v4457_v45 = vld [vmem:[%s6115_s5 + $0x90] sm:$0xff]  }
 0x30e   : > { %v5602_v18 = vmax.f32 %v1759_v40, %v1761_v4  ;;  %v1644_v22 = vadd.f32 %v4276_v17, %v1515_v60  ;;  %v1635_v38 = vpop.f32.mrb[71].mxu1  ;;  %v1848_v2 = vrot.slane %v5598_v8, 2  ;;  %v1715_v43 = vrot.slane %v1641_v10, 1  ;;  %v4452_v4 = vld [vmem:[%s6115_s5 + $0xc8] sm:$0xff]  }
 0x30f   : > { %v1711_v14 = vrot.slane %v1633_v35, 1  ;;  %v1636_v33 = vadd.f32 %v1635_v38, %v1507_v5 }
 0x310   : > { %v1717_v15 = vrot.slane %v1644_v22, 1  ;;  %v4366_v52 = vpack.i.bf16 %v1843_v19, %v1848_v2  ;;  %v1856_v62 = vrot.slane %v5602_v18, 2  ;;  %v1862_v32 = vrot.slane %v5602_v18, 6 }
 0x311   : > { %v1712_v34 = vsel %vm851_vm3, %v1709_v39, %v1711_v14  ;;  %v1713_v59 = vrot.slane %v1636_v33, 1 }
 0x312   : > { %v1762_v51 = vmax.f32 %v1628_v26, %v1712_v34  ;;  %v1718_v7 = vsel %vm851_vm3, %v1715_v43, %v1717_v15  ;;  %4367 = vrot.lane.b32.xlu1 %v4366_v52, %s4645_s25  ;;  %v4371_v56 = vpack.i.bf16 %v1856_v62, %v1862_v32  ;;  %v1766_v12 = vmax.f32 %v1644_v22, %v1717_v15  ;;  %v4460_v22 = vld [vmem:[%s6115_s5 + $0xd8] sm:$0xff]   ;;  %v4463_v52 = vld [vmem:[%s6115_s5 + $0x200] sm:$0xff]   ;;  %v4468_v32 = vld [vmem:[%s6115_s5 + $0xe8] sm:$0xff]  }
 0x313   : > { %v1765_v58 = vmax.f32 %v1641_v10, %v1718_v7  ;;  %v1714_v44 = vsel %vm851_vm3, %v1711_v14, %v1713_v59  ;;  %v1716_v36 = vsel %vm851_vm3, %v1713_v59, %v1715_v43  ;;  %v4461_v43 = vld [vmem:[%s6115_s5 + $0x98] sm:$0xff]   ;;  %v4464_v14 = vld [vmem:[%s6115_s5 + $0xe0] sm:$0xff]   ;;  %v4467_v59 = vld [vmem:[%s6115_s5 + $0x208] sm:$0xff]  }
 0x314   : > { %v1763_v53 = vmax.f32 %v1633_v35, %v1714_v44  ;;  %v1764_v31 = vmax.f32 %v1636_v33, %v1716_v36  ;;  %4372 = vrot.lane.b32.xlu0 %v4371_v56, %s4645_s25  ;;  %v5614_v37 = vmax.f32 %v1760_v16, %v1762_v51  ;;  %v1803_v35 = vrot.slane %v5524_v6, 4  ;;  %v4465_v62 = vld [vmem:[%s6115_s5 + $0xa0] sm:$0xff]   ;;  %v4470_v7 = vld [vmem:[%s6115_s5 + $0x250] sm:$0xff]  }
 0x315   : > { %v4472_v44 = vld [vmem:[%s6115_s5 + $0xf0] sm:$0xff]  }
 0x316   : > { %v5616_v48 = vmax.f32 %v1763_v53, %v1765_v58  ;;  %v5618_v57 = vmax.f32 %v1764_v31, %v1766_v12  ;;  %v1867_v46 = vrot.slane %v5614_v37, 2  ;;  %v4469_v58 = vld [vmem:[%s6115_s5 + $0xa8] sm:$0xff]   ;;  %v4471_v53 = vld [vmem:[%s6115_s5 + $0x210] sm:$0xff]  }
 0x318   : > { %v1875_v20 = vrot.slane %v5616_v48, 2  ;;  %v1881_v26 = vrot.slane %v5616_v48, 6  ;;  %v1886_v30 = vrot.slane %v5618_v57, 2 }
 0x31a   : > { %v4376_v25 = vpack.i.bf16 %v1867_v46, %v1875_v20  ;;  %v4381_v49 = vpack.i.bf16 %v1881_v26, %v1886_v30  ;;  %v4474_v20 = vld [vmem:[%s6115_s5 + $0x258] sm:$0xff]   ;;  %v4473_v30 = vld [vmem:[%s6115_s5 + $0xb0] sm:$0xff]  }
 0x31c   : > { %4377 = vrot.lane.b32.xlu1 %v4376_v25, %s4645_s25  ;;  %4382 = vrot.lane.b32.xlu0 %v4381_v49, %s4645_s25  ;;  %v4476_v25 = vld [vmem:[%s6115_s5 + $0xf8] sm:$0xff]   ;;  %v1822_v49 = vrot.slane %v5560_v0, 4  ;;  %s3576_s25 = sshll.u32 %s325_s21, 4  ;;  %s6069_s25 = int_to_ptr.vmem [resolvable:$true] %s3576_s25 }
 0x31d   : > { %s4578_s17 = scalar_lea.vmem %s6069_s25, 16  ;;  %p4585_p0 = scmp.lt.s32.totalorder %s6069_s25, %s4583_s27 }
 0x31e   : > { %p4579_p11 = scmp.ne.s32.totalorder %s6069_s25, %s4578_s17  ;;  %p4586_p1 = scmp.lt.s32.totalorder %s4584_s28, %s4578_s17 }
 0x320   : > { %p4580_p12 = pnand %p4579_p11, %p4736_p5  ;;  %p4587_p2 = por %p4586_p1, %p4585_p0 }
 0x322   : > { %p4581_p13 = pneg %p4580_p12 }
 0x324   : > { %p4588_p3 = pnand %p4587_p2, %p4581_p13 }
 0x366   : > { %v4343_v24 = vpop.permute.xlu0 %4342 }
 0x367   : > { %v4345_v39 = vunpack.i.h.bf16 %v4343_v24  ;;  %v4344_v54 = vunpack.i.l.bf16 %v4343_v24 }
 0x369   : > { %v1795_v42 = vsel %vm1044_vm6, %v5485_v41, %v4345_v39  ;;  %v1796_v47 = vsel %vm1044_vm6, %v1784_v28, %v4344_v54  ;;  %v4453_v41 = vld [vmem:[%s6115_s5 + $0x88] sm:$0xff]   ;;  %v4475_v39 = vld [vmem:[%s6115_s5 + $0x218] sm:$0xff]   ;;  %v4478_v54 = vld [vmem:[%s6115_s5 + $0x260] sm:$0xff]  }
 0x36a   : > { %v1893_v61 = vmax.f32 %v1795_v42, 0.0  ;;  %v1894_v3 = vmax.f32 %v1796_v47, 0.0  ;;  %v4477_v42 = vld [vmem:[%s6115_s5 + $0xb8] sm:$0xff]  }
 0x36c   : > { %v1911_v29 = vpack.c.bf16 %v1893_v61, %v1893_v61  ;;  %v1912_v27 = vpack.c.bf16 %v1894_v3, %v1894_v3  ;;  %v4479_v61 = vld [vmem:[%s6115_s5 + $0x220] sm:$0xff]  }
 0x36e   : > { %v5636_v55 = vpop.permute.xlu1 %4347  ;;  %3114 = vmatprep.mubr.bf16.mxu0 %v1912_v27  ;;  %v4481_v27 = vld [vmem:[%s6115_s5 + $0x180] sm:$0xff]  }
 0x36f   : > { %v4349_v11 = vunpack.i.l.bf16 %v5636_v55  ;;  %3115 = vmatmul.mubr.bf16.vlgmr.msra.gmra.mrb[60].mxu0 %v1911_v29  ;;  %v4350_v12 = vunpack.i.h.bf16 %v5636_v55  ;;  %v4482_v29 = vld [vmem:[%s6115_s5 + $0x268] sm:$0xff]  }
 0x370   : > { %3999 = vmatpush3.bf16.msra.mxu0 %v4449_v50 }
 0x371   : > { %4000 = vmatprep.subr.bf16.mxu0 %v4452_v4  ;;  %v1814_v60 = vsel %vm1044_vm6, %v5524_v6, %v4349_v11  ;;  %v1797_v24 = vsel %vm1044_vm6, %v5517_v63, %v4350_v12  ;;  %v4480_v63 = vld [vmem:[%s6115_s5 + $0x1c0] sm:$0xff]   ;;  %v4484_v4 = vld [vmem:[%s6115_s5 + $0x1c8] sm:$0xff]   ;;  %v4503_v12 = vld [vmem:[%s6115_s5 + $0x310] sm:$0xff]  }
 0x372   : > { %v1896_v40 = vmax.f32 %v1814_v60, 0.0  ;;  %v1895_v47 = vmax.f32 %v1797_v24, 0.0 }
 0x374   : > { %4001 = vmatpush3.bf16.msra.mxu0 %v4453_v41  ;;  %v4353_v16 = vpop.permute.xlu0 %4352  ;;  %v1914_v10 = vpack.c.bf16 %v1896_v40, %v1896_v40  ;;  %v1913_v50 = vpack.c.bf16 %v1895_v47, %v1895_v47  ;;  %v4483_v41 = vld [vmem:[%s6115_s5 + $0x228] sm:$0xff]  }
 0x375   : > { %v4355_v17 = vunpack.i.h.bf16 %v4353_v16  ;;  %v4354_v5 = vunpack.i.l.bf16 %v4353_v16  ;;  %4002 = vmatprep.subr.bf16.mxu0 %v4456_v9  ;;  %v4486_v9 = vld [vmem:[%s6115_s5 + $0x270] sm:$0xff]   ;;  %v4485_v40 = vld [vmem:[%s6115_s5 + $0x188] sm:$0xff]  }
 0x376   : > { %3154 = vmatprep.mubr.bf16.mxu0 %v1914_v10  ;;  %v5684_v56 = vpop.permute.xlu1 %4357  ;;  %v4488_v10 = vld [vmem:[%s6115_s5 + $0x1d0] sm:$0xff]   ;;  %v4516_v47 = vld [vmem:[%s6115_s5 + $0x2c8] sm:$0xff]  }
 0x377   : > { %v1815_v38 = vsel %vm1044_vm6, %v1803_v35, %v4355_v17  ;;  %v1816_v19 = vsel %vm1044_vm6, %v5556_v21, %v4354_v5  ;;  %v4466_v21 = vld [vmem:[%s6115_s5 + $0x248] sm:$0xff]   ;;  %v4359_v46 = vunpack.i.l.bf16 %v5684_v56  ;;  %v4490_v35 = vld [vmem:[%s6115_s5 + $0x278] sm:$0xff]   ;;  %v1860_v17 = vrot.slane %v5602_v18, 4 }
 0x378   : > { %v1897_v2 = vmax.f32 %v1815_v38, 0.0  ;;  %4003 = vmatpush3.bf16.msra.mxu0 %v4457_v45  ;;  %v1898_v6 = vmax.f32 %v1816_v19, 0.0  ;;  %v4487_v45 = vld [vmem:[%s6115_s5 + $0x230] sm:$0xff]   ;;  %v4492_v38 = vld [vmem:[%s6115_s5 + $0x1d8] sm:$0xff]  }
 0x379   : > { %4004 = vmatprep.subr.bf16.mxu0 %v4460_v22  ;;  %v1834_v28 = vsel %vm1044_vm6, %v1822_v49, %v4359_v46  ;;  %v4489_v22 = vld [vmem:[%s6115_s5 + $0x190] sm:$0xff]   ;;  %v4509_v49 = vld [vmem:[%s6115_s5 + $0x1b8] sm:$0xff]  }
 0x37a   : > { %v1915_v33 = vpack.c.bf16 %v1897_v2, %v1897_v2  ;;  %v1916_v15 = vpack.c.bf16 %v1898_v6, %v1898_v6  ;;  %v1900_v3 = vmax.f32 %v1834_v28, 0.0  ;;  %v4491_v2 = vld [vmem:[%s6115_s5 + $0x238] sm:$0xff]   ;;  %v4505_v46 = vld [vmem:[%s6115_s5 + $0x1b0] sm:$0xff]   ;;  %v4513_v28 = vld [vmem:[%s6115_s5 + $0x280] sm:$0xff]  }
 0x37b   : > { %v4493_v6 = vld [vmem:[%s6115_s5 + $0x198] sm:$0xff]  }
 0x37c   : > { %4005 = vmatpush3.bf16.msra.mxu0 %v4461_v43  ;;  %3194 = vmatprep.mubr.bf16.mxu1 %v1916_v15  ;;  %v1918_v11 = vpack.c.bf16 %v1900_v3, %v1900_v3  ;;  %v4495_v15 = vld [vmem:[%s6115_s5 + $0x300] sm:$0xff]   ;;  %v4515_v3 = vld [vmem:[%s6115_s5 + $0x328] sm:$0xff]  }
 0x37d   : > { %3195 = vmatmul.mubr.bf16.vlgmr.msra.gmra.mrb[72].mxu1 %v1915_v33  ;;  %4006 = vmatprep.subr.bf16.mxu0 %v4464_v14  ;;  %v4496_v33 = vld [vmem:[%s6115_s5 + $0x1e0] sm:$0xff]  }
 0x37e   : > { %4065 = vmatpush3.bf16.msra.mxu1 %v4463_v52  ;;  %v5675_v34 = vpop.permute.xlu0 %4362 }
 0x37f   : > { %v4364_v51 = vunpack.i.l.bf16 %v5675_v34  ;;  %4066 = vmatprep.subr.bf16.mxu1 %v4466_v21  ;;  %v4365_v60 = vunpack.i.h.bf16 %v5675_v34  ;;  %v4498_v21 = vld [vmem:[%s6115_s5 + $0x348] sm:$0xff]  }
 0x380   : > { %4007 = vmatpush3.bf16.msra.mxu0 %v4465_v62  ;;  %v4500_v34 = vld [vmem:[%s6115_s5 + $0x1e8] sm:$0xff]  }
 0x381   : > { %4008 = vmatprep.subr.bf16.mxu0 %v4468_v32  ;;  %v1852_v36 = vsel %vm1044_vm6, %v5583_v23, %v4364_v51  ;;  %v1835_v5 = vsel %vm1044_vm6, %v5579_v13, %v4365_v60  ;;  %v4494_v13 = vld [vmem:[%s6115_s5 + $0x340] sm:$0xff]   ;;  %v4502_v51 = vld [vmem:[%s6115_s5 + $0x350] sm:$0xff]  }
 0x382   : > { %4067 = vmatpush3.bf16.msra.mxu1 %v4467_v59  ;;  %v1902_v31 = vmax.f32 %v1852_v36, 0.0  ;;  %v1901_v43 = vmax.f32 %v1835_v5, 0.0  ;;  %v4497_v32 = vld [vmem:[%s6115_s5 + $0x1a0] sm:$0xff]   ;;  %v4499_v59 = vld [vmem:[%s6115_s5 + $0x308] sm:$0xff]   ;;  %v4360_v36 = vunpack.i.h.bf16 %v5684_v56  ;;  %v4508_v56 = vld [vmem:[%s6115_s5 + $0x1f8] sm:$0xff]  }
 0x383   : > { %4068 = vmatprep.subr.bf16.mxu1 %v4470_v7  ;;  %v4521_v60 = vld [vmem:[%s6115_s5 + $0x290] sm:$0xff]   ;;  %v4527_v5 = vld [vmem:[%s6115_s5 + $0x400] sm:$0xff]  }
 0x384   : > { %4009 = vmatpush3.bf16.msra.mxu0 %v4469_v58  ;;  %v1920_v26 = vpack.c.bf16 %v1902_v31, %v1902_v31  ;;  %v1919_v52 = vpack.c.bf16 %v1901_v43, %v1901_v43  ;;  %v5798_v7 = vpop.permute.xlu1 %4367  ;;  %v4501_v58 = vld [vmem:[%s6115_s5 + $0x1a8] sm:$0xff]   ;;  %v4506_v31 = vld [vmem:[%s6115_s5 + $0x358] sm:$0xff]  }
 0x385   : > { %4010 = vmatprep.subr.bf16.mxu0 %v4472_v44  ;;  %v4504_v44 = vld [vmem:[%s6115_s5 + $0x1f0] sm:$0xff]   ;;  %v4532_v43 = vld [vmem:[%s6115_s5 + $0x2e8] sm:$0xff]  }
 0x386   : > { %4069 = vmatpush3.bf16.msra.mxu1 %v4471_v53  ;;  %3274 = vmatprep.mubr.bf16.mxu1 %v1920_v26  ;;  %v5736_v55 = vpop.permute.xlu0 %4372  ;;  %v4369_v53 = vunpack.i.l.bf16 %v5798_v7  ;;  %v4507_v26 = vld [vmem:[%s6115_s5 + $0x318] sm:$0xff]  }
 0x387   : > { %4070 = vmatprep.subr.bf16.mxu1 %v4474_v20  ;;  %v4374_v16 = vunpack.i.l.bf16 %v5736_v55  ;;  %v1833_v20 = vsel %vm1044_vm6, %v5560_v0, %v4360_v36  ;;  %v4512_v0 = vld [vmem:[%s6115_s5 + $0x2c0] sm:$0xff]   ;;  %v4541_v36 = vld [vmem:[%s6115_s5 + $0x2b8] sm:$0xff]  }
 0x388   : > { %4011 = vmatpush3.bf16.msra.mxu0 %v4473_v30  ;;  %v4510_v30 = vld [vmem:[%s6115_s5 + $0x360] sm:$0xff]   ;;  %v1899_v24 = vmax.f32 %v1833_v20, 0.0 }
 0x389   : > { %4012 = vmatprep.subr.bf16.mxu0 %v4476_v25  ;;  %v1872_v19 = vsel %vm1044_vm6, %v1860_v17, %v4374_v16  ;;  %v1854_v25 = vsel %vm1044_vm6, %v5598_v8, %v4369_v53  ;;  %v4514_v8 = vld [vmem:[%s6115_s5 + $0x368] sm:$0xff]   ;;  %v4544_v53 = vld [vmem:[%s6115_s5 + $0x3c0] sm:$0xff]  }
 0x38a   : > { %4071 = vmatpush3.bf16.msra.mxu1 %v4475_v39  ;;  %v1906_v14 = vmax.f32 %v1872_v19, 0.0  ;;  %v4511_v39 = vld [vmem:[%s6115_s5 + $0x320] sm:$0xff]  }
 0x38b   : > { %4072 = vmatprep.subr.bf16.mxu1 %v4478_v54  ;;  %v1904_v54 = vmax.f32 %v1854_v25, 0.0  ;;  %v4545_v20 = vld [vmem:[%s6115_s5 + $0x380] sm:$0xff]  }
 0x38c   : > { %4013 = vmatpush3.bf16.msra.mxu0 %v4477_v42  ;;  %v1924_v62 = vpack.c.bf16 %v1906_v14, %v1906_v14  ;;  %v1917_v42 = vpack.c.bf16 %v1899_v24, %v1899_v24  ;;  %v4550_v24 = vld [vmem:[%s6115_s5 + $0x470] sm:$0xff]  }
 0x38d   : > { %4042 = vmatprep.subr.bf16.mxu0 %v4480_v63 }
 0x38e   : > { %4073 = vmatpush3.bf16.msra.mxu1 %v4479_v61  ;;  %v5848_v63 = vpop.permute.xlu0 %4382  ;;  %v1922_v61 = vpack.c.bf16 %v1904_v54, %v1904_v54  ;;  %v5910_v14 = vpop.permute.xlu1 %4377  ;;  %v4552_v54 = vld [vmem:[%s6115_s5 + $0x3d0] sm:$0xff]  }
 0x38f   : > { %3155 = vmatmul.mubr.bf16.vlgmr.msra.gmra.mrb[64].mxu0 %v1913_v50  ;;  %4074 = vmatprep.subr.bf16.mxu1 %v4482_v29  ;;  %v4518_v29 = vld [vmem:[%s6115_s5 + $0x370] sm:$0xff]   ;;  %v4517_v50 = vld [vmem:[%s6115_s5 + $0x288] sm:$0xff]  }
 0x390   : > { %4043 = vmatpush3.bf16.msra.mxu0 %v4481_v27  ;;  %3234 = vmatprep.mubr.bf16.mxu0 %v1918_v11  ;;  %v4375_v27 = vunpack.i.h.bf16 %v5736_v55  ;;  %v4520_v11 = vld [vmem:[%s6115_s5 + $0x2d0] sm:$0xff]   ;;  %v4522_v55 = vld [vmem:[%s6115_s5 + $0x378] sm:$0xff]  }
 0x391   : > { %4044 = vmatprep.subr.bf16.mxu0 %v4484_v4  ;;  %v4384_v4 = vunpack.i.l.bf16 %v5848_v63 }
 0x392   : > { %4075 = vmatpush3.bf16.msra.mxu1 %v4483_v41  ;;  %v4519_v41 = vld [vmem:[%s6115_s5 + $0x330] sm:$0xff]  }
 0x393   : > { %4076 = vmatprep.subr.bf16.mxu1 %v4486_v9  ;;  %v1871_v9 = vsel %vm1044_vm6, %v5602_v18, %v4375_v27  ;;  %v1892_v16 = vsel %vm1044_vm6, %v5618_v57, %v4384_v4  ;;  %v4526_v18 = vld [vmem:[%s6115_s5 + $0x440] sm:$0xff]  }
 0x394   : > { %4045 = vmatpush3.bf16.msra.mxu0 %v4485_v40  ;;  %v4524_v40 = vld [vmem:[%s6115_s5 + $0x2d8] sm:$0xff]   ;;  %v1910_v17 = vmax.f32 %v1892_v16, 0.0  ;;  %v4528_v57 = vld [vmem:[%s6115_s5 + $0x2e0] sm:$0xff]  }
 0x395   : > { %4046 = vmatprep.subr.bf16.mxu0 %v4488_v10  ;;  %v4523_v10 = vld [vmem:[%s6115_s5 + $0x338] sm:$0xff]   ;;  %v4558_v27 = vld [vmem:[%s6115_s5 + $0x3e0] sm:$0xff]  }
 0x396   : > { %4077 = vmatpush3.bf16.msra.mxu1 %v4487_v45  ;;  %v1905_v45 = vmax.f32 %v1871_v9, 0.0  ;;  %v1928_v19 = vpack.c.bf16 %v1910_v17, %v1910_v17  ;;  %v4559_v4 = vld [vmem:[%s6115_s5 + $0x3a0] sm:$0xff]   ;;  %v4380_v9 = vunpack.i.h.bf16 %v5910_v14  ;;  %v4568_v17 = vld [vmem:[%s6117_s7 + $0x10] sm:$0xff]  }
 0x397   : > { %4078 = vmatprep.subr.bf16.mxu1 %v4490_v35  ;;  %v4525_v35 = vld [vmem:[%s6115_s5 + $0x298] sm:$0xff]  }
 0x398   : > { %4047 = vmatpush3.bf16.msra.mxu0 %v4489_v22  ;;  %v1923_v22 = vpack.c.bf16 %v1905_v45, %v1905_v45  ;;  %v1873_v16 = vsel %vm1044_vm6, %v5614_v37, %v4380_v9  ;;  %v4567_v37 = vld [vmem:[%s6117_s7 + $0x8] sm:$0xff]  }
 0x399   : > { %4048 = vmatprep.subr.bf16.mxu0 %v4492_v38  ;;  %v4530_v38 = vld [vmem:[%s6115_s5 + $0x448] sm:$0xff]   ;;  %v1907_v45 = vmax.f32 %v1873_v16, 0.0 }
 0x39a   : > { %4079 = vmatpush3.bf16.msra.mxu1 %v4491_v2  ;;  %v4529_v2 = vld [vmem:[%s6115_s5 + $0x2a0] sm:$0xff]  }
 0x39b   : > { %4108 = vmatprep.subr.bf16.mxu1 %v4494_v13  ;;  %v4531_v13 = vld [vmem:[%s6115_s5 + $0x408] sm:$0xff]  }
 0x39c   : > { %4049 = vmatpush3.bf16.msra.mxu0 %v4493_v6  ;;  %v4534_v6 = vld [vmem:[%s6115_s5 + $0x450] sm:$0xff]  }
 0x39d   : > { %3275 = vmatmul.mubr.bf16.vlgmr.msra.gmra.mrb[76].mxu1 %v1919_v52  ;;  %4050 = vmatprep.subr.bf16.mxu0 %v4496_v33  ;;  %v4533_v33 = vld [vmem:[%s6115_s5 + $0x2a8] sm:$0xff]   ;;  %v4370_v52 = vunpack.i.h.bf16 %v5798_v7 }
 0x39e   : > { %4109 = vmatpush3.bf16.msra.mxu1 %v4495_v15  ;;  %3354 = vmatprep.mubr.bf16.mxu1 %v1924_v62  ;;  %v4536_v15 = vld [vmem:[%s6115_s5 + $0x2f0] sm:$0xff]   ;;  %v4379_v62 = vunpack.i.l.bf16 %v5910_v14  ;;  %v4573_v14 = vld [vmem:[%s6117_s7 + $0x38] sm:$0xff]  }
 0x39f   : > { %4110 = vmatprep.subr.bf16.mxu1 %v4498_v21  ;;  %v4535_v21 = vld [vmem:[%s6115_s5 + $0x410] sm:$0xff]  }
 0x3a0   : > { %4051 = vmatpush3.bf16.msra.mxu0 %v4497_v32  ;;  %v4538_v32 = vld [vmem:[%s6115_s5 + $0x458] sm:$0xff]  }
 0x3a1   : > { %4052 = vmatprep.subr.bf16.mxu0 %v4500_v34  ;;  %v1841_v34 = vrot.slane %v5583_v23, 4  ;;  %v4542_v23 = vld [vmem:[%s6115_s5 + $0x460] sm:$0xff]  }
 0x3a2   : > { %4111 = vmatpush3.bf16.msra.mxu1 %v4499_v59  ;;  %v4537_v59 = vld [vmem:[%s6115_s5 + $0x2b0] sm:$0xff]  }
 0x3a3   : > { %4112 = vmatprep.subr.bf16.mxu1 %v4502_v51  ;;  %v4540_v51 = vld [vmem:[%s6115_s5 + $0x2f8] sm:$0xff]   ;;  %v1853_v7 = vsel %vm1044_vm6, %v1841_v34, %v4370_v52 }
 0x3a4   : > { %4053 = vmatpush3.bf16.msra.mxu0 %v4501_v58  ;;  %v4539_v58 = vld [vmem:[%s6115_s5 + $0x418] sm:$0xff]  }
 0x3a5   : > { %4054 = vmatprep.subr.bf16.mxu0 %v4504_v44  ;;  %v1890_v44 = vsel %vm1044_vm6, %v5616_v48, %v4379_v62 }
 0x3a6   : > { %4113 = vmatpush3.bf16.msra.mxu1 %v4503_v12  ;;  %v1903_v12 = vmax.f32 %v1853_v7, 0.0 }
 0x3a7   : > { %4114 = vmatprep.subr.bf16.mxu1 %v4506_v31  ;;  %v4543_v31 = vld [vmem:[%s6115_s5 + $0x420] sm:$0xff]  }
 0x3a8   : > { %4055 = vmatpush3.bf16.msra.mxu0 %v4505_v46  ;;  %v1908_v46 = vmax.f32 %v1890_v44, 0.0 }
 0x3a9   : > { %4056 = vmatprep.subr.bf16.mxu0 %v4508_v56  ;;  %v4546_v56 = vld [vmem:[%s6115_s5 + $0x468] sm:$0xff]  }
 0x3aa   : > { %4115 = vmatpush3.bf16.msra.mxu1 %v4507_v26  ;;  %v1921_v26 = vpack.c.bf16 %v1903_v12, %v1903_v12  ;;  %v1926_v25 = vpack.c.bf16 %v1908_v46, %v1908_v46 }
 0x3ab   : > { %4116 = vmatprep.subr.bf16.mxu1 %v4510_v30  ;;  %v4548_v30 = vld [vmem:[%s6115_s5 + $0x3c8] sm:$0xff]  }
 0x3ac   : > { %4057 = vmatpush3.bf16.msra.mxu0 %v4509_v49  ;;  %v4547_v49 = vld [vmem:[%s6115_s5 + $0x428] sm:$0xff]  }
 0x3ad   : > { %4086 = vmatprep.subr.bf16.mxu0 %v4512_v0  ;;  %v4385_v0 = vunpack.i.h.bf16 %v5848_v63  ;;  %v4553_v63 = vld [vmem:[%s6115_s5 + $0x390] sm:$0xff]  }
 0x3ae   : > { %4117 = vmatpush3.bf16.msra.mxu1 %v4511_v39  ;;  %v4549_v39 = vld [vmem:[%s6115_s5 + $0x388] sm:$0xff]  }
 0x3af   : > { %3235 = vmatmul.mubr.bf16.vlgmr.msra.gmra.mrb[68].mxu0 %v1917_v42  ;;  %4118 = vmatprep.subr.bf16.mxu1 %v4514_v8  ;;  %v1879_v8 = vrot.slane %v5616_v48, 4  ;;  %v4554_v42 = vld [vmem:[%s6115_s5 + $0x478] sm:$0xff]  }
 0x3b0   : > { %4087 = vmatpush3.bf16.msra.mxu0 %v4513_v28  ;;  %3314 = vmatprep.mubr.bf16.mxu0 %v1922_v61  ;;  %v4551_v28 = vld [vmem:[%s6115_s5 + $0x430] sm:$0xff]   ;;  %v4556_v48 = vld [vmem:[%s6115_s5 + $0x3d8] sm:$0xff]  }
 0x3b1   : > { %4088 = vmatprep.subr.bf16.mxu0 %v4516_v47  ;;  %v1891_v47 = vsel %vm1044_vm6, %v1879_v8, %v4385_v0  ;;  %v4555_v61 = vld [vmem:[%s6115_s5 + $0x438] sm:$0xff]  }
 0x3b2   : > { %4119 = vmatpush3.bf16.msra.mxu1 %v4515_v3  ;;  %v1909_v3 = vmax.f32 %v1891_v47, 0.0 }
 0x3b3   : > { %4120 = vmatprep.subr.bf16.mxu1 %v4518_v29  ;;  %v4557_v29 = vld [vmem:[%s6115_s5 + $0x398] sm:$0xff]  }
 0x3b4   : > { %4089 = vmatpush3.bf16.msra.mxu0 %v4517_v50  ;;  %v1927_v50 = vpack.c.bf16 %v1909_v3, %v1909_v3 }
 0x3b5   : > { %4090 = vmatprep.subr.bf16.mxu0 %v4520_v11  ;;  %v4560_v11 = vld [vmem:[%s6115_s5 + $0x3e8] sm:$0xff]  }
 0x3b6   : > { %4121 = vmatpush3.bf16.msra.mxu1 %v4519_v41  ;;  %v4561_v41 = vld [vmem:[%s6115_s5 + $0x3a8] sm:$0xff]  }
 0x3b7   : > { %4122 = vmatprep.subr.bf16.mxu1 %v4522_v55  ;;  %v4562_v55 = vld [vmem:[%s6115_s5 + $0x3f0] sm:$0xff]  }
 0x3b8   : > { %4091 = vmatpush3.bf16.msra.mxu0 %v4521_v60  ;;  %v4563_v60 = vld [vmem:[%s6115_s5 + $0x3b0] sm:$0xff]  }
 0x3b9   : > { %4092 = vmatprep.subr.bf16.mxu0 %v4524_v40  ;;  %v4564_v40 = vld [vmem:[%s6115_s5 + $0x3f8] sm:$0xff]  }
 0x3ba   : > { %4123 = vmatpush3.bf16.msra.mxu1 %v4523_v10  ;;  %v4565_v10 = vld [vmem:[%s6115_s5 + $0x3b8] sm:$0xff]  }
 0x3bb   : > { %4152 = vmatprep.subr.bf16.mxu1 %v4526_v18  ;;  %v1925_v18 = vpack.c.bf16 %v1907_v45, %v1907_v45 }
 0x3bc   : > { %4093 = vmatpush3.bf16.msra.mxu0 %v4525_v35  ;;  %v4566_v35 = vld [vmem:[%s6117_s7] sm:$0xff]  }
 0x3bd   : > { %3355 = vmatmul.mubr.bf16.vlgmr.msra.gmra.mrb[80].mxu1 %v1923_v22  ;;  %4094 = vmatprep.subr.bf16.mxu0 %v4528_v57  ;;  %v4569_v57 = vld [vmem:[%s6117_s7 + $0x18] sm:$0xff]   ;;  %v4571_v22 = vld [vmem:[%s6117_s7 + $0x28] sm:$0xff]  }
 0x3be   : > { %4153 = vmatpush3.bf16.msra.mxu1 %v4527_v5  ;;  %3434 = vmatprep.mubr.bf16.mxu1 %v1928_v19  ;;  %v4570_v5 = vld [vmem:[%s6117_s7 + $0x20] sm:$0xff]  }
 0x3bf   : > { %4154 = vmatprep.subr.bf16.mxu1 %v4530_v38 }
 0x3c0   : > { %4095 = vmatpush3.bf16.msra.mxu0 %v4529_v2 }
 0x3c1   : > { %4096 = vmatprep.subr.bf16.mxu0 %v4532_v43 }
 0x3c2   : > { %4155 = vmatpush3.bf16.msra.mxu1 %v4531_v13 }
 0x3c3   : > { %4156 = vmatprep.subr.bf16.mxu1 %v4534_v6  ;;  %v4572_v6 = vld [vmem:[%s6117_s7 + $0x30] sm:$0xff]  }
 0x3c4   : > { %4097 = vmatpush3.bf16.msra.mxu0 %v4533_v33 }
 0x3c5   : > { %4098 = vmatprep.subr.bf16.mxu0 %v4536_v15 }
 0x3c6   : > { %4157 = vmatpush3.bf16.msra.mxu1 %v4535_v21 }
 0x3c7   : > { %4158 = vmatprep.subr.bf16.mxu1 %v4538_v32  ;;  %v2217_v32 = vld [vmem:[%s6116_s6] sm:$0x1] }
 0x3c8   : > { %4099 = vmatpush3.bf16.msra.mxu0 %v4537_v59 }
 0x3c9   : > { %4100 = vmatprep.subr.bf16.mxu0 %v4540_v51 }
 0x3ca   : > { %4159 = vmatpush3.bf16.msra.mxu1 %v4539_v58 }
 0x3cb   : > { %4160 = vmatprep.subr.bf16.mxu1 %v4542_v23 }
 0x3cc   : > { %4101 = vmatpush3.bf16.msra.mxu0 %v4541_v36 }
 0x3cd   : > { %4130 = vmatprep.subr.bf16.mxu0 %v4544_v53 }
 0x3ce   : > { %4161 = vmatpush3.bf16.msra.mxu1 %v4543_v31 }
 0x3cf   : > { %3315 = vmatmul.mubr.bf16.vlgmr.msra.gmra.mrb[72].mxu0 %v1921_v26  ;;  %4162 = vmatprep.subr.bf16.mxu1 %v4546_v56 }
 0x3d0   : > { %4131 = vmatpush3.bf16.msra.mxu0 %v4545_v20  ;;  %3394 = vmatprep.mubr.bf16.mxu0 %v1926_v25 }
 0x3d1   : > { %4132 = vmatprep.subr.bf16.mxu0 %v4548_v30 }
 0x3d2   : > { %4163 = vmatpush3.bf16.msra.mxu1 %v4547_v49 }
 0x3d3   : > { %4164 = vmatprep.subr.bf16.mxu1 %v4550_v24 }
 0x3d4   : > { %4133 = vmatpush3.bf16.msra.mxu0 %v4549_v39 }
 0x3d5   : > { %4134 = vmatprep.subr.bf16.mxu0 %v4552_v54 }
 0x3d6   : > { %4165 = vmatpush3.bf16.msra.mxu1 %v4551_v28 }
 0x3d7   : > { %4166 = vmatprep.subr.bf16.mxu1 %v4554_v42 }
 0x3d8   : > { %4135 = vmatpush3.bf16.msra.mxu0 %v4553_v63 }
 0x3d9   : > { %4136 = vmatprep.subr.bf16.mxu0 %v4556_v48 }
 0x3da   : > { %4167 = vmatpush3.bf16.msra.mxu1 %v4555_v61 }
 0x3dc   : > { %4137 = vmatpush3.bf16.msra.mxu0 %v4557_v29 }
 0x3dd   : > { %3435 = vmatmul.mubr.bf16.vlgmr.msra.gmra.mrb[84].mxu1 %v1927_v50  ;;  %4138 = vmatprep.subr.bf16.mxu0 %v4558_v27 }
 0x3e0   : > { %4139 = vmatpush3.bf16.msra.mxu0 %v4559_v4 }
 0x3e1   : > { %4140 = vmatprep.subr.bf16.mxu0 %v4560_v11 }
 0x3e4   : > { %4141 = vmatpush3.bf16.msra.mxu0 %v4561_v41 }
 0x3e5   : > { %4142 = vmatprep.subr.bf16.mxu0 %v4562_v55 }
 0x3e8   : > { %4143 = vmatpush3.bf16.msra.mxu0 %v4563_v60 }
 0x3e9   : > { %4144 = vmatprep.subr.bf16.mxu0 %v4564_v40 }
 0x3ec   : > { %4145 = vmatpush3.bf16.msra.mxu0 %v4565_v10 }
 0x3ed   : > { %4277 = vmatprep.subr.bf16.mxu0 %v4642_v1 }
 0x3ef   : > { %3395 = vmatmul.mubr.bf16.vlgmr.msra.gmra.mrb[76].mxu0 %v1925_v18 }
 0x3f0   : > { %4293 = vmatprep.mubr.msk.bf16.mxu0 %vm4643_vm0, %v4642_v1  ;;  %4278 = vmatpush3.bf16.msra.mxu0 %v4566_v35 }
 0x3f1   : > { %4279 = vmatprep.subr.bf16.mxu0 %v4642_v1 }
 0x3f4   : > { %4280 = vmatpush3.bf16.msra.mxu0 %v4567_v37  ;;  %v3460_v37 = vld [vmem:[%s6118_s8] sm:$0x1] }
 0x3f5   : > { %4281 = vmatprep.subr.bf16.mxu0 %v4642_v1 }
 0x3f8   : > { %4282 = vmatpush3.bf16.msra.mxu0 %v4568_v17 }
 0x3f9   : > { %4283 = vmatprep.subr.bf16.mxu0 %v4642_v1 }
 0x3fc   : > { %4284 = vmatpush3.bf16.msra.mxu0 %v4569_v57 }
 0x3fd   : > { %4285 = vmatprep.subr.bf16.mxu0 %v4642_v1 }
 0x400   : > { %4286 = vmatpush3.bf16.msra.mxu0 %v4570_v5 }
 0x401   : > { %4287 = vmatprep.subr.bf16.mxu0 %v4642_v1 }
 0x404   : > { %4288 = vmatpush3.bf16.msra.mxu0 %v4571_v22 }
 0x405   : > { %4289 = vmatprep.subr.bf16.mxu0 %v4642_v1 }
 0x408   : > { %4290 = vmatpush3.bf16.msra.mxu0 %v4572_v6 }
 0x409   : > { %4291 = vmatprep.subr.bf16.mxu0 %v4642_v1 }
 0x40c   : > { %4292 = vmatpush3.bf16.msra.mxu0 %v4573_v14 }
 0x442   : > { %v3992_v38 = vpop.f32.mrb[60].mxu0 }
 0x443   : > { %v3993_v19 = vpop.f32.mrb[61].mxu0 }
 0x444   : > { %v3994_v2 = vadd.f32 %v3993_v19, %v3992_v38  ;;  %v3995_v43 = vpop.f32.mrb[62].mxu0 }
 0x445   : > { %v3996_v13 = vpop.f32.mrb[63].mxu0 }
 0x446   : > { %v3117_v51 = vadd.f32 %v3994_v2, %v2217_v32 }
 0x450   : > { %v4036_v33 = vpop.f32.mrb[72].mxu1 }
 0x451   : > { %v4037_v15 = vpop.f32.mrb[73].mxu1 }
 0x452   : > { %v4038_v52 = vadd.f32 %v4037_v15, %v4036_v33  ;;  %v4039_v21 = vpop.f32.mrb[74].mxu1 }
 0x453   : > { %v4040_v62 = vpop.f32.mrb[75].mxu1 }
 0x462   : > { %v4014_v34 = vpop.f32.mrb[64].mxu0 }
 0x463   : > { %v4015_v59 = vpop.f32.mrb[65].mxu0 }
 0x464   : > { %v4016_v7 = vadd.f32 %v4015_v59, %v4014_v34  ;;  %v4017_v58 = vpop.f32.mrb[66].mxu0 }
 0x465   : > { %v4018_v1 = vpop.f32.mrb[67].mxu0 }
 0x466   : > { %v3157_v23 = vadd.f32 %v4016_v7, %v3117_v51 }
 0x468   : > { %v3197_v44 = vadd.f32 %v4038_v52, %v3157_v23 }
 0x470   : > { %v4080_v36 = vpop.f32.mrb[76].mxu1 }
 0x471   : > { %v4081_v12 = vpop.f32.mrb[77].mxu1 }
 0x472   : > { %v4082_v53 = vadd.f32 %v4081_v12, %v4080_v36  ;;  %v4083_v31 = vpop.f32.mrb[78].mxu1 }
 0x473   : > { %v4084_v46 = vpop.f32.mrb[79].mxu1 }
 0x482   : > { %v4058_v56 = vpop.f32.mrb[68].mxu0 }
 0x483   : > { %v4059_v20 = vpop.f32.mrb[69].mxu0 }
 0x484   : > { %v4060_v26 = vadd.f32 %v4059_v20, %v4058_v56  ;;  %v4061_v30 = vpop.f32.mrb[70].mxu0 }
 0x485   : > { %v4062_v25 = vpop.f32.mrb[71].mxu0 }
 0x486   : > { %v3237_v49 = vadd.f32 %v4060_v26, %v3197_v44 }
 0x488   : > { %v3277_v24 = vadd.f32 %v4082_v53, %v3237_v49 }
 0x490   : > { %v4124_v0 = vpop.f32.mrb[80].mxu1 }
 0x491   : > { %v4125_v39 = vpop.f32.mrb[81].mxu1 }
 0x492   : > { %v4126_v54 = vadd.f32 %v4125_v39, %v4124_v0  ;;  %v4127_v8 = vpop.f32.mrb[82].mxu1 }
 0x493   : > { %v4128_v28 = vpop.f32.mrb[83].mxu1 }
 0x4a2   : > { %v4102_v42 = vpop.f32.mrb[72].mxu0 }
 0x4a3   : > { %v4103_v47 = vpop.f32.mrb[73].mxu0 }
 0x4a4   : > { %v4104_v63 = vadd.f32 %v4103_v47, %v4102_v42  ;;  %v4105_v48 = vpop.f32.mrb[74].mxu0 }
 0x4a5   : > { %v4106_v61 = vpop.f32.mrb[75].mxu0 }
 0x4a6   : > { %v3317_v3 = vadd.f32 %v4104_v63, %v3277_v24 }
 0x4a8   : > { %v3357_v29 = vadd.f32 %v4126_v54, %v3317_v3 }
 0x4b0   : > { %v4168_v27 = vpop.f32.mrb[84].mxu1 }
 0x4b1   : > { %v4169_v50 = vpop.f32.mrb[85].mxu1 }
 0x4b2   : > { %v4170_v4 = vadd.f32 %v4169_v50, %v4168_v27  ;;  %v4171_v11 = vpop.f32.mrb[86].mxu1 }
 0x4b3   : > { %v4172_v41 = vpop.f32.mrb[87].mxu1 }
 0x4c2   : > { %v4146_v55 = vpop.f32.mrb[76].mxu0 }
 0x4c3   : > { %v4147_v9 = vpop.f32.mrb[77].mxu0 }
 0x4c4   : > { %v4148_v60 = vadd.f32 %v4147_v9, %v4146_v55  ;;  %v4149_v40 = vpop.f32.mrb[78].mxu0 }
 0x4c5   : > { %v4150_v16 = vpop.f32.mrb[79].mxu0 }
 0x4c6   : > { %v3397_v10 = vadd.f32 %v4148_v60, %v3357_v29 }
 0x4c8   : > { %v3437_v45 = vadd.f32 %v4170_v4, %v3397_v10 }
 0x4ca   : > { %v3442_v18 = vmax.f32 %v3437_v45, 0.0 }
 0x4cc   : > { %v3443_v35 = vpack.c.bf16 %v3442_v18, %v3442_v18 }
 0x4ce   : > { %4294 = vmatmul.mubr.bf16.vlgmr.msra.gmra.mrb[80].mxu0 %v3443_v35 }
 0x5a1   : > { %v3543_v17 = vpop.f32.mrb[80].mxu0 }
 0x5a2   : > { %v3544_v57 = vadd.f32 %v3543_v17, %v3460_v37  ;;  %v4295_v5 = vpop.f32.mrb[81].mxu0 }
 0x5a3   : > { %v3546_v22 = vpop.f32.mrb[82].mxu0 }
 0x5a4   : > { %v4296_v38 = vpop.f32.mrb[83].mxu0  ;;  %v3550_v19 = vsel %vm3549_vm8, %v3544_v57, -inf }
 0x5a5   : > { %3551 = vmax.xlane.f32.xlu1 %v3550_v19 }
 0x632   : > { %v3552_v2 = vpop.xlane.xlu1 %3551 }
 0x633   : > { %v3553_v43 = vsub.f32 %v3544_v57, %v3552_v2 }
 0x635   : > { %v3554_v13 = vmul.f32 1.442695, %v3553_v43 }
 0x637   : > { %4574 = vpow2.f32 %v3554_v13 }
 0x641   : > { %v4575_v6 = vpop.eup %4574 }
 0x642   : > { %v3556_v14 = vsel %vm3549_vm8, %v4575_v6, 0.0 }
 0x643   : > { %3557 = vadd.xlane.f32.xlu0 %v3556_v14 }
 0x6d0   : > { %v3558_v33 = vpop.xlane.xlu0 %3557 }
 0x6d1   : > { %4576 = vlog2.f32 %v3558_v33 }
 0x6db   : > { %v4577_v15 = vpop.eup %4576 }
 0x6dc   : > { %v3560_v52 = vmul.f32 0.6931472, %v4577_v15 }
 0x6de   : > { %v3561_v21 = vsub.f32 %v3553_v43, %v3560_v52 }
 0x6e0   : > { %3562 = vst.msk [vmem:[%s325_s21] sm:$0x1] %vm3549_vm8, %v3561_v21 }
 0x6e1   : > { %4591 = shalt.err (!%p4588_p3)
}
 0x6e2   : > { %s4592_s29 = scalar_lea.hbm %s6067_s24, 16  ;;  %s4596_s21 = scalar_lea.hbm %s6119_s9, 32 }
 0x6e3   : > { %p4593_p4 = scmp.ne.s32.totalorder %s6067_s24, %s4592_s29  ;;  %p4597_p9 = scmp.lt.u32.totalorder %s6067_s24, %s6119_s9 }
 0x6e4   : > { %p4598_p10 = scmp.lt.u32.totalorder %s4596_s21, %s4592_s29  ;;  %p4600_p12 = scmp.lt.u32.totalorder %s4592_s29, %s6067_s24 }
 0x6e5   : > { %p4594_p7 = pnand %p4593_p4, %p4736_p5 }
 0x6e6   : > { %p4599_p11 = por %p4598_p10, %p4597_p9 }
 0x6e7   : > { %p4595_p8 = pneg %p4594_p7 }
 0x6e8   : > { %p4601_p13 = por %p4600_p12, %p4599_p11 }
 0x6ea   : > { %p4602_p0 = pnand %p4601_p13, %p4595_p8 }
 0x6ec   : > { %4605 = shalt.err (!%p4602_p0)
}
 0x6ed   : > { %4297 = dma.vmem_to_hbm [thread:$0]  (%p4736_p5), %s6069_s25, 16, %s6067_s24, %s3564_s26  }
 0x6ee PF: > { %p4303_p1 = scmp.ge.s32.totalorder %s4640_s12, 2  ;;  %s3588_s17 = sand.u32 1, %s4628_s30  }
 0x6ef   : > { %s3589_s13 = scalar_lea.sflag [#allocation3], %s3588_s17 }
 0x6f0   : > { %p4300_p2 = pnand %p4303_p1, %p4740_p6 }
 0x6f2   : > { %4623 = dma.done.wait (!%p4300_p2), %s3589_s13, 16  }
 0x6f3   : > { %4625 = vsyncadd (!%p4300_p2), %s3589_s13, 4294967280  ;;  %p19_p3 = scmp.ge.s32.totalorder %s4723_s15, 4   ;;  %s6122_s30 = smov %s4632_s10 }
 0x6f4   : > { %s6123_s10 = smov %s4636_s11  ;;  %s6124_s11 = smov %s4734_s18 }
 0x6f5   : > { %s6125_s12 = smov %s4723_s15  ;;  %21 = sbr.rel (!%p19_p3) target bundleno = 3 (0x3), region = 91 }
 0x6fc   :  { %3593 = vsyncpa [#allocation3], 1 }
 0x6fd   :  { %3595 = vsyncpa [#allocation3 + $0x1], 1 }

</bundles_post_ra>
